<compile_context>
chip_gen: v7x
topology: tpu7x:2x2x1
jax: 0.10.0
libtpu: 0.0.40
codegen_flags: <defaults>
</compile_context>

<pallas_src>
import functools

import jax
import jax.numpy as jnp
from jax.experimental import pallas as pl
from jax.experimental.pallas import tpu as pltpu

C = 192          # fixed by the module (in_ch = 192)
EPS_GUMBEL = 1e-10
EPS_BN = 1e-5


def _gate_kernel(x_ref, w1_ref, b1_ref, w2_ref, b2_ref, u_ref,
                 xo_ref, gate_ref, *, bt):
    # x_ref block: (bt, C, HW) in the streaming dtype (e.g. bf16).
    # Per-sample math stays in the simple 2-D (C, *) layout; bt is small and
    # static so the Python loop is fully unrolled.
    for b in range(bt):
        xb = x_ref[b]                                               # (C, HW)

        # AdaptiveAvgPool2d(1): global mean over spatial dims (f32 accumulate).
        pooled = jnp.mean(xb.astype(jnp.float32), axis=-1,
                          keepdims=True)                            # (C, 1)

        # inp_gate: 1x1 conv (dense 192x192 matmul) with BatchNorm folded in,
        # then ReLU.
        h = jnp.dot(w1_ref[...], pooled,
                    preferred_element_type=jnp.float32) + b1_ref[...]
        h = jnp.maximum(h, 0.0)                                     # (C, 1)

        # inp_gate_l: grouped 1x1 conv (groups=C, 2 outputs per channel):
        # logits[c, k] = w2[c, k] * h[c] + b2[c, k]
        logits = w2_ref[...] * h + b2_ref[...]                      # (C, 2)

        # GumbleSoftmax(force_hard=True): add Gumbel noise, hard argmax.
        u = u_ref[b]                                                # (C, 2)
        g = -jnp.log(EPS_GUMBEL - jnp.log(u + EPS_GUMBEL))
        z = logits + g
        gate = (z[:, 1:2] > z[:, 0:1]).astype(jnp.float32)          # (C, 1)

        gate_ref[b] = gate
        # x * hatten_d[:, :, 1]: gate is exactly 0/1, so the multiply is exact
        # in the streaming dtype (bf16 or f32).
        xo_ref[b] = xb * gate.astype(xb.dtype)


def _pick_batch_tile(B, per_sample_bytes):
    """Samples per grid step: big enough to amortize per-step overhead, small
    enough that double-buffered x/x_out blocks plus f32 pooling temporaries fit
    v7x's 64 MiB VMEM, and keeping >=2 grid steps so the 'parallel' batch axis
    can be sharded across both v7x TensorCores."""
    target = max(1, (2 * 1024 * 1024) // per_sample_bytes)          # ~2 MiB/step
    vmem_cap = max(1, (40 * 1024 * 1024) // (8 * per_sample_bytes))
    bt = min(B, target, vmem_cap)
    if B >= 2:
        bt = min(bt, max(1, B // 2))   # keep a multi-step parallel axis
    while B % bt:                       # exact tiling of the batch
        bt -= 1
    return bt


@jax.jit
def gate_module_192(x_nchw, params, u_noise):
    """x_nchw: (B, 192, H, W).  Returns (gated x, gate (B, 192, 1) f32).

    x is streamed in its own dtype (pass bf16 to halve HBM traffic); the gate
    math runs in f32.  Donate x_nchw at the jit boundary to let the aliased
    output reuse its HBM buffer."""
    B, Cin, H, W = x_nchw.shape
    assert Cin == C
    HW = H * W
    x = x_nchw.reshape(B, C, HW)

    w1, b1, bn_scale, bn_shift, w2, b2 = params
    # Fold the eval-mode BatchNorm affine into the 1x1 conv.
    w1f = (w1 * bn_scale).astype(jnp.float32)
    b1f = (b1 * bn_scale + bn_shift).astype(jnp.float32)
    # TODO(synk): training-mode BatchNorm (batch statistics) and the
    # straight-through gradient of the hard Gumbel gate are not implemented;
    # this is the eval/inference forward path only.

    per_sample = C * HW * jnp.dtype(x.dtype).itemsize
    bt = _pick_batch_tile(B, per_sample)

    # VMEM: x + x_out double-buffered, plus f32 pooling temporaries, plus the
    # small resident params; clamp to stay legal on v7x (64 MiB physical).
    vmem_est = (4 * per_sample + 4 * C * HW) * bt \
        + 2 * (C * C + 6 * C) * 4 + (1 << 20)
    vmem_limit = int(min(max(vmem_est, 32 * 1024 * 1024), 48 * 1024 * 1024))
    # TODO(synk): for very large H*W (block no longer fits VMEM) add an inner
    # HW tiling axis (two-phase: pooled reduction, then gated multiply).

    grid_spec = pltpu.PrefetchScalarGridSpec(
        num_scalar_prefetch=0,
        grid=(B // bt,),
        in_specs=[
            pl.BlockSpec((bt, C, HW), lambda i: (i, 0, 0)),   # x
            pl.BlockSpec((C, C),      lambda i: (0, 0)),      # conv weight (BN folded)
            pl.BlockSpec((C, 1),      lambda i: (0, 0)),      # conv bias   (BN folded)
            pl.BlockSpec((C, 2),      lambda i: (0, 0)),      # grouped-conv weight
            pl.BlockSpec((C, 2),      lambda i: (0, 0)),      # grouped-conv bias
            pl.BlockSpec((bt, C, 2),  lambda i: (i, 0, 0)),   # uniform noise
        ],
        out_specs=[
            pl.BlockSpec((bt, C, HW), lambda i: (i, 0, 0)),   # gated x (aliases x)
            pl.BlockSpec((bt, C, 1),  lambda i: (i, 0, 0)),   # gate
        ],
    )

    xo, gate = pl.pallas_call(
        functools.partial(_gate_kernel, bt=bt),
        grid_spec=grid_spec,
        out_shape=(
            jax.ShapeDtypeStruct((B, C, HW), x.dtype),
            jax.ShapeDtypeStruct((B, C, 1), jnp.float32),
        ),
        input_output_aliases={0: 0},
        compiler_params=pltpu.CompilerParams(
            dimension_semantics=("parallel",),
            vmem_limit_bytes=vmem_limit),
    )(x, w1f, b1f, w2, b2, u_noise)

    return xo.reshape(B, C, H, W), gate


def _reference(x_nchw, params, u_noise):
    """Pure-JAX reference of the same forward pass (for validation)."""
    w1, b1, bn_scale, bn_shift, w2, b2 = params
    pooled = jnp.mean(x_nchw.astype(jnp.float32), axis=(2, 3))      # (B, C)
    w1f = w1 * bn_scale
    b1f = (b1 * bn_scale + bn_shift)[:, 0]
    h = pooled @ w1f.T + b1f
    h = jnp.maximum(h, 0.0)
    logits = h[:, :, None] * w2[None] + b2[None]                    # (B, C, 2)
    g = -jnp.log(EPS_GUMBEL - jnp.log(u_noise + EPS_GUMBEL))
    z = logits + g
    gate = (z[:, :, 1] > z[:, :, 0]).astype(jnp.float32)            # (B, C)
    xo = x_nchw * gate[:, :, None, None].astype(x_nchw.dtype)
    return xo, gate[:, :, None]


def make_params(key):
    k1, k2, k3, k4 = jax.random.split(key, 4)
    # Conv2d(192, 192, 1x1) weight/bias (kernel dims squeezed).
    w1 = 0.05 * jax.random.normal(k1, (C, C), jnp.float32)
    b1 = 0.05 * jax.random.normal(k2, (C, 1), jnp.float32)
    # BatchNorm2d(192), eval semantics with default init/running stats.
    gamma = jnp.ones((C, 1), jnp.float32)
    beta = jnp.zeros((C, 1), jnp.float32)
    running_mean = jnp.zeros((C, 1), jnp.float32)
    running_var = jnp.ones((C, 1), jnp.float32)
    bn_scale = gamma / jnp.sqrt(running_var + EPS_BN)
    bn_shift = beta - running_mean * bn_scale
    # Conv2d(192, 384, 1x1, groups=192): weight (384,1,1,1) -> (C,2), bias -> (C,2)
    w2 = 0.5 * jax.random.normal(k3, (C, 2), jnp.float32)
    b2 = 0.5 * jax.random.normal(k4, (C, 2), jnp.float32)
    return (w1, b1, bn_scale, bn_shift, w2, b2)


if __name__ == "__main__":
    key = jax.random.PRNGKey(0)
    kx, ku, kp = jax.random.split(key, 3)

    B, H, W = 2, 16, 16
    # bf16 activations: halves the HBM traffic of this bandwidth-bound kernel;
    # the pooled/conv/Gumbel math stays in f32 inside the kernel.
    x = jax.random.normal(kx, (B, C, H, W), jnp.float32).astype(jnp.bfloat16)
    # Deterministic uniform samples feeding the Gumbel noise (the forward uses
    # noise even in the hard/eval path).
    u_noise = jax.random.uniform(ku, (B, C, 2), jnp.float32,
                                 minval=1e-6, maxval=1.0 - 1e-6)
    params = make_params(kp)

    xo, gate = gate_module_192(x, params, u_noise)
    xo = jax.block_until_ready(xo)
    gate = jax.block_until_ready(gate)

    xo_ref, gate_ref = _reference(x, params, u_noise)
    assert xo.shape == x.shape and xo.dtype == x.dtype
    assert jnp.array_equal(gate, gate_ref), "gate mismatch"
    assert jnp.allclose(xo.astype(jnp.float32), xo_ref.astype(jnp.float32),
                        atol=1e-6, rtol=1e-6), "output mismatch"

    print("KERNEL_OK")
</pallas_src>

<mosaic_0001>
module attributes {stable_mosaic.version = 11 : i64} {
  func.func @_gate_kernel(%arg0: i32, %arg1: memref<1x192x256xbf16, #tpu.memory_space<vmem>>, %arg2: memref<192x192xf32, #tpu.memory_space<vmem>>, %arg3: memref<192x1xf32, #tpu.memory_space<vmem>>, %arg4: memref<192x2xf32, #tpu.memory_space<vmem>>, %arg5: memref<192x2xf32, #tpu.memory_space<vmem>>, %arg6: memref<1x192x2xf32, #tpu.memory_space<vmem>>, %arg7: memref<1x192x256xbf16, #tpu.memory_space<vmem>>, %arg8: memref<1x192x1xf32, #tpu.memory_space<vmem>>) attributes {dimension_semantics = [#tpu.dimension_semantics<parallel>], iteration_bounds = array<i64: 2>, scalar_prefetch = 0 : i64, scratch_operands = 0 : i64, tpu.core_type = #tpu.core_type<tc>, window_params = [{transform_indices = @transform_0, window_bounds = array<i64: 1, 192, 256>}, {pipeline_mode = #tpu.pipeline_mode<synchronous>, transform_indices = @transform_1, window_bounds = array<i64: 192, 192>}, {pipeline_mode = #tpu.pipeline_mode<synchronous>, transform_indices = @transform_2, window_bounds = array<i64: 192, 1>}, {pipeline_mode = #tpu.pipeline_mode<synchronous>, transform_indices = @transform_3, window_bounds = array<i64: 192, 2>}, {pipeline_mode = #tpu.pipeline_mode<synchronous>, transform_indices = @transform_4, window_bounds = array<i64: 192, 2>}, {transform_indices = @transform_5, window_bounds = array<i64: 1, 192, 2>}, {transform_indices = @transform_6, window_bounds = array<i64: 1, 192, 256>}, {transform_indices = @transform_7, window_bounds = array<i64: 1, 192, 1>}]} {
    %c0 = arith.constant 0 : index
    %c0_0 = arith.constant 0 : index
    %c0_1 = arith.constant 0 : index
    %0 = vector.load %arg1[%c0, %c0_0, %c0_1] : memref<1x192x256xbf16, #tpu.memory_space<vmem>>, vector<1x192x256xbf16>
    %1 = vector.shape_cast %0 : vector<1x192x256xbf16> to vector<192x256xbf16>
    %2 = arith.extf %1 : vector<192x256xbf16> to vector<192x256xf32>
    %cst = arith.constant dense<0.000000e+00> : vector<192xf32>
    %3 = vector.multi_reduction <add>, %2, %cst [1] : vector<192x256xf32> to vector<192xf32>
    %4 = vector.shape_cast %3 : vector<192xf32> to vector<192x1xf32>
    %cst_2 = arith.constant 2.560000e+02 : f32
    %5 = vector.broadcast %cst_2 : f32 to vector<192x1xf32>
    %6 = arith.divf %4, %5 : vector<192x1xf32>
    %c0_3 = arith.constant 0 : index
    %c0_4 = arith.constant 0 : index
    %7 = vector.load %arg2[%c0_3, %c0_4] : memref<192x192xf32, #tpu.memory_space<vmem>>, vector<192x192xf32>
    %cst_5 = arith.constant dense<0.000000e+00> : vector<192x1xf32>
    %8 = tpu.matmul %7, %6, %cst_5 {dimension_numbers = #tpu.dot_dimension_numbers<[1], [0], [0], [1], [0, 0, 1, 1], [], []>} : vector<192x192xf32>, vector<192x1xf32>, vector<192x1xf32> -> vector<192x1xf32>
    %c0_6 = arith.constant 0 : index
    %c0_7 = arith.constant 0 : index
    %9 = vector.load %arg3[%c0_6, %c0_7] : memref<192x1xf32, #tpu.memory_space<vmem>>, vector<192x1xf32>
    %10 = arith.addf %8, %9 : vector<192x1xf32>
    %cst_8 = arith.constant 0.000000e+00 : f32
    %11 = vector.broadcast %cst_8 : f32 to vector<192x1xf32>
    %12 = arith.maximumf %10, %11 : vector<192x1xf32>
    %c0_9 = arith.constant 0 : index
    %c0_10 = arith.constant 0 : index
    %13 = vector.load %arg4[%c0_9, %c0_10] : memref<192x2xf32, #tpu.memory_space<vmem>>, vector<192x2xf32>
    %14 = vector.broadcast %12 : vector<192x1xf32> to vector<192x2xf32>
    %15 = arith.mulf %13, %14 : vector<192x2xf32>
    %c0_11 = arith.constant 0 : index
    %c0_12 = arith.constant 0 : index
    %16 = vector.load %arg5[%c0_11, %c0_12] : memref<192x2xf32, #tpu.memory_space<vmem>>, vector<192x2xf32>
    %17 = arith.addf %15, %16 : vector<192x2xf32>
    %c0_13 = arith.constant 0 : index
    %c0_14 = arith.constant 0 : index
    %c0_15 = arith.constant 0 : index
    %18 = vector.load %arg6[%c0_13, %c0_14, %c0_15] : memref<1x192x2xf32, #tpu.memory_space<vmem>>, vector<1x192x2xf32>
    %19 = vector.shape_cast %18 : vector<1x192x2xf32> to vector<192x2xf32>
    %cst_16 = arith.constant 1.000000e-10 : f32
    %20 = vector.broadcast %cst_16 : f32 to vector<192x2xf32>
    %21 = arith.addf %19, %20 : vector<192x2xf32>
    %22 = math.log %21 : vector<192x2xf32>
    %cst_17 = arith.constant 1.000000e-10 : f32
    %23 = vector.broadcast %cst_17 : f32 to vector<192x2xf32>
    %24 = arith.subf %23, %22 : vector<192x2xf32>
    %25 = math.log %24 : vector<192x2xf32>
    %cst_18 = arith.constant 0.000000e+00 : f32
    %26 = vector.broadcast %cst_18 : f32 to vector<192x2xf32>
    %27 = arith.subf %26, %25 : vector<192x2xf32>
    %28 = arith.addf %17, %27 : vector<192x2xf32>
    %29 = vector.extract_strided_slice %28 {offsets = [0, 1], sizes = [192, 1], strides = [1, 1]} : vector<192x2xf32> to vector<192x1xf32>
    %30 = vector.extract_strided_slice %28 {offsets = [0, 0], sizes = [192, 1], strides = [1, 1]} : vector<192x2xf32> to vector<192x1xf32>
    %31 = arith.cmpf ogt, %29, %30 : vector<192x1xf32>
    %32 = arith.extui %31 : vector<192x1xi1> to vector<192x1xi32>
    %33 = arith.sitofp %32 : vector<192x1xi32> to vector<192x1xf32>
    %c0_19 = arith.constant 0 : index
    %c0_20 = arith.constant 0 : index
    %c0_21 = arith.constant 0 : index
    %34 = vector.load %arg8[%c0_19, %c0_20, %c0_21] : memref<1x192x1xf32, #tpu.memory_space<vmem>>, vector<1x192x1xf32>
    %35 = vector.shape_cast %34 : vector<1x192x1xf32> to vector<192x1xf32>
    %36 = vector.shape_cast %33 : vector<192x1xf32> to vector<1x192x1xf32>
    tpu.vector_store %arg8[%c0_19, %c0_20, %c0_21], %36 {strides = array<i32>} : memref<1x192x1xf32, #tpu.memory_space<vmem>>, vector<1x192x1xf32>,
    %37 = arith.truncf %33 : vector<192x1xf32> to vector<192x1xbf16>
    %38 = vector.broadcast %37 : vector<192x1xbf16> to vector<192x256xbf16>
    %39 = arith.mulf %1, %38 : vector<192x256xbf16>
    %c0_22 = arith.constant 0 : index
    %c0_23 = arith.constant 0 : index
    %c0_24 = arith.constant 0 : index
    %40 = vector.load %arg7[%c0_22, %c0_23, %c0_24] : memref<1x192x256xbf16, #tpu.memory_space<vmem>>, vector<1x192x256xbf16>
    %41 = vector.shape_cast %40 : vector<1x192x256xbf16> to vector<192x256xbf16>
    %42 = vector.shape_cast %39 : vector<192x256xbf16> to vector<1x192x256xbf16>
    tpu.vector_store %arg7[%c0_22, %c0_23, %c0_24], %42 {strides = array<i32>} : memref<1x192x256xbf16, #tpu.memory_space<vmem>>, vector<1x192x256xbf16>,
    return
  }
  func.func @transform_0(%arg0: i32) -> (i32, i32, i32) {
    %c0_i32 = arith.constant 0 : i32
    %c0_i32_0 = arith.constant 0 : i32
    %c0_i32_1 = arith.constant 0 : i32
    return %arg0, %c0_i32, %c0_i32_0 : i32, i32, i32
  }
  func.func @transform_1(%arg0: i32) -> (i32, i32) {
    %c0_i32 = arith.constant 0 : i32
    %c0_i32_0 = arith.constant 0 : i32
    %c0_i32_1 = arith.constant 0 : i32
    return %c0_i32, %c0_i32_0 : i32, i32
  }
  func.func @transform_2(%arg0: i32) -> (i32, i32) {
    %c0_i32 = arith.constant 0 : i32
    %c0_i32_0 = arith.constant 0 : i32
    %c0_i32_1 = arith.constant 0 : i32
    return %c0_i32, %c0_i32_0 : i32, i32
  }
  func.func @transform_3(%arg0: i32) -> (i32, i32) {
    %c0_i32 = arith.constant 0 : i32
    %c0_i32_0 = arith.constant 0 : i32
    %c0_i32_1 = arith.constant 0 : i32
    return %c0_i32, %c0_i32_0 : i32, i32
  }
  func.func @transform_4(%arg0: i32) -> (i32, i32) {
    %c0_i32 = arith.constant 0 : i32
    %c0_i32_0 = arith.constant 0 : i32
    %c0_i32_1 = arith.constant 0 : i32
    return %c0_i32, %c0_i32_0 : i32, i32
  }
  func.func @transform_5(%arg0: i32) -> (i32, i32, i32) {
    %c0_i32 = arith.constant 0 : i32
    %c0_i32_0 = arith.constant 0 : i32
    %c0_i32_1 = arith.constant 0 : i32
    return %arg0, %c0_i32, %c0_i32_0 : i32, i32, i32
  }
  func.func @transform_6(%arg0: i32) -> (i32, i32, i32) {
    %c0_i32 = arith.constant 0 : i32
    %c0_i32_0 = arith.constant 0 : i32
    %c0_i32_1 = arith.constant 0 : i32
    return %arg0, %c0_i32, %c0_i32_0 : i32, i32, i32
  }
  func.func @transform_7(%arg0: i32) -> (i32, i32, i32) {
    %c0_i32 = arith.constant 0 : i32
    %c0_i32_0 = arith.constant 0 : i32
    %c0_i32_1 = arith.constant 0 : i32
    return %arg0, %c0_i32, %c0_i32_0 : i32, i32, i32
  }
}

</mosaic_0001>

<bundles_post_ra>
// kernel: mul.9
= control target key start
LH: loop header
LB: loop body
LE: loop exit
PB: predicated region body
PF: predicated region fallthrough
CT: control target
= control target key end

     0   :  { %s56_s0 = inlined_call_operand.vmem [shape: f32[192,1], index: 0, kind: input, shape index: {}]   ;;  %s57_s1 = inlined_call_operand.vmem [shape: f32[192,1], index: 1, kind: input, shape index: {}]   ;;  %s58_s2 = inlined_call_operand.vmem [shape: f32[192,1], index: 2, kind: output, shape index: {}]  }
   0x1   :  { %v3_v0 = vld [vmem:[%s56_s0] sm:$0x1]  ;;  %v20_v2 = vld [vmem:[%s56_s0 + $0x1] sm:$0x1] }
   0x2   :  { %v4_v1 = vld [vmem:[%s57_s1] sm:$0x1]  ;;  %v21_v4 = vld [vmem:[%s57_s1 + $0x1] sm:$0x1] }
   0x3   :  { %v7_v3 = vmul.f32 %v4_v1, %v3_v0  ;;  %v16_v5 = vmul.f32 %v21_v4, %v20_v2 }
   0x5   :  { %9 = vst [vmem:[%s58_s2] sm:$0x1] %v7_v3  ;;  %22 = vst [vmem:[%s58_s2 + $0x1] sm:$0x1] %v16_v5 }

// kernel: gate_module_192.1
= control target key start
LH: loop header
LB: loop body
LE: loop exit
PB: predicated region body
PF: predicated region fallthrough
CT: control target
= control target key end

     0   :  { %s2322_s24 = smov 0   ;;  %s3202_s0 = inlined_call_operand.vmem [shape: bf16[2,192,256], index: 0, kind: input, shape index: {}, may-alias: {0,6}]   ;;  %s3203_s1 = inlined_call_operand.vmem [shape: f32[192,192], index: 1, kind: input, shape index: {}]   ;;  %s3204_s2 = inlined_call_operand.vmem [shape: f32[192,1], index: 2, kind: input, shape index: {}]   ;;  %s3205_s3 = inlined_call_operand.vmem [shape: f32[192,2], index: 3, kind: input, shape index: {}]   ;;  %s3206_s4 = inlined_call_operand.vmem [shape: f32[192,2], index: 4, kind: input, shape index: {}]   ;;  %s3207_s5 = inlined_call_operand.vmem [shape: f32[2,192,2], index: 5, kind: input, shape index: {}]   ;;  %s3208_s6 = inlined_call_operand.vmem [shape: bf16[2,192,256], index: 6, kind: output, shape index: {0}, may-alias: {0,6}]   ;;  %s3209_s7 = inlined_call_operand.vmem [shape: f32[2,192,1], index: 7, kind: output, shape index: {1}]  }
   0x1 LB: > { %s1968_s25 = sadd.s32 4294967295, %s2272_s24   ;;  %p1972_p0 = scmp.ge.s32.totalorder %s2272_s24, 1  ;;  %s2272_s24 = sphi %s2322_s24, %s18_s24  }
   0x2   : > { %p250_p1 = scmp.lt.s32.totalorder %s2272_s24, 3 }
   0x4   : > { %p251_p2 = pnand %p1972_p0, %p250_p1 }
   0x6   : > { %254 = sbr.rel (%p251_p2) target bundleno = 893 (0x37d), region = 44 }
   0xd   : > { %p292_p3 = scmp.lt.s32.totalorder %s1968_s25, 1  ;;  %vm553_vm0 = vcmask 523264   ;;  %s2277_s12 = smov 1  }
   0xf   : > { %s3214_s25 = smov (!%p292_p3, %s1968_s25), 1 }
  0x10   : > { %s2330_s26 = smul.u32 192, %s3214_s25 }
  0x12   : > { %s2336_s29 = scalar_lea.vmem %s3202_s0, %s2330_s26  ;;  %s2718_s13 = scalar_lea.vmem %s3207_s5, %s2330_s26 }
  0x13   : > { %v2339_v0 = vld [vmem:[%s2336_s29 + $0x10] sm:$0xff]  ;;  %v312_v1 = vld [vmem:[%s2336_s29] sm:$0xff]  ;;  %v2343_v2 = vld [vmem:[%s2336_s29 + $0x18] sm:$0xff]  ;;  %s3067_s18 = scalar_lea.vmem %s3209_s7, %s2330_s26  ;;  %s3087_s21 = scalar_lea.vmem %s3208_s6, %s2330_s26 }
  0x14   : > { %v340_v3 = vunpack.c.l.bf16 %v2339_v0  ;;  %v341_v4 = vunpack.c.h.bf16 %v2339_v0  ;;  %v336_v5 = vunpack.c.l.bf16 %v312_v1  ;;  %v337_v6 = vunpack.c.h.bf16 %v312_v1  ;;  %v313_v7 = vld [vmem:[%s2336_s29 + $0x8] sm:$0xff]  ;;  %v2354_v13 = vld [vmem:[%s2336_s29 + $0x20] sm:$0xff]  ;;  %v2361_v22 = vld [vmem:[%s2336_s29 + $0x38] sm:$0xff] }
  0x15   : > { %v2349_v8 = vld [vmem:[%s2336_s29 + $0x28] sm:$0xff]  ;;  %v342_v9 = vunpack.c.l.bf16 %v2343_v2  ;;  %v343_v10 = vunpack.c.h.bf16 %v2343_v2  ;;  %v338_v11 = vunpack.c.l.bf16 %v313_v7  ;;  %v339_v12 = vunpack.c.h.bf16 %v313_v7  ;;  %v2364_v23 = vld [vmem:[%s2336_s29 + $0x30] sm:$0xff]  ;;  %v2374_v31 = vld [vmem:[%s2336_s29 + $0x40] sm:$0xff] }
  0x16   : > { %v390_v14 = vadd.f32 %v341_v4, %v340_v3  ;;  %v384_v15 = vadd.f32 %v337_v6, %v336_v5  ;;  %v346_v16 = vunpack.c.l.bf16 %v2349_v8  ;;  %v347_v17 = vunpack.c.h.bf16 %v2349_v8  ;;  %v2371_v30 = vld [vmem:[%s2336_s29 + $0x48] sm:$0xff]  ;;  %v2381_v38 = vld [vmem:[%s2336_s29 + $0x58] sm:$0xff]  ;;  %v2384_v39 = vld [vmem:[%s2336_s29 + $0x50] sm:$0xff] }
  0x17   : > { %v393_v18 = vadd.f32 %v343_v10, %v342_v9  ;;  %v387_v19 = vadd.f32 %v339_v12, %v338_v11  ;;  %v344_v20 = vunpack.c.l.bf16 %v2354_v13  ;;  %v345_v21 = vunpack.c.h.bf16 %v2354_v13  ;;  %v2391_v46 = vld [vmem:[%s2336_s29 + $0x68] sm:$0xff]  ;;  %v2394_v47 = vld [vmem:[%s2336_s29 + $0x60] sm:$0xff]  ;;  %v2401_v54 = vld [vmem:[%s2336_s29 + $0x78] sm:$0xff] }
  0x18   : > { %391 = vadd.xlane.f32.xlu1 %v390_v14  ;;  %385 = vadd.xlane.f32.xlu0 %v384_v15  ;;  %v399_v24 = vadd.f32 %v347_v17, %v346_v16  ;;  %v350_v25 = vunpack.c.l.bf16 %v2361_v22  ;;  %v351_v27 = vunpack.c.h.bf16 %v2361_v22  ;;  %v348_v28 = vunpack.c.l.bf16 %v2364_v23  ;;  %v2404_v55 = vld [vmem:[%s2336_s29 + $0x70] sm:$0xff]  ;;  %v2411_v62 = vld [vmem:[%s2336_s29 + $0x88] sm:$0xff]  ;;  %v2414_v63 = vld [vmem:[%s2336_s29 + $0x80] sm:$0xff] }
  0x19   : > { %v396_v26 = vadd.f32 %v345_v21, %v344_v20  ;;  %v349_v29 = vunpack.c.h.bf16 %v2364_v23  ;;  %v354_v32 = vunpack.c.l.bf16 %v2371_v30  ;;  %v355_v33 = vunpack.c.h.bf16 %v2371_v30  ;;  %v2423_v10 = vld [vmem:[%s2336_s29 + $0x98] sm:$0xff]  ;;  %v2426_v11 = vld [vmem:[%s2336_s29 + $0x90] sm:$0xff]  ;;  %v2436_v20 = vld [vmem:[%s2336_s29 + $0xa0] sm:$0xff] }
  0x1a   : > { %v405_v34 = vadd.f32 %v351_v27, %v350_v25  ;;  %v352_v36 = vunpack.c.l.bf16 %v2374_v31  ;;  %v353_v37 = vunpack.c.h.bf16 %v2374_v31  ;;  %v358_v41 = vunpack.c.l.bf16 %v2381_v38 }
  0x1b   : > { %v402_v35 = vadd.f32 %v349_v29, %v348_v28  ;;  %v411_v40 = vadd.f32 %v355_v33, %v354_v32  ;;  %v359_v43 = vunpack.c.h.bf16 %v2381_v38  ;;  %v356_v44 = vunpack.c.l.bf16 %v2384_v39  ;;  %v2443_v29 = vld [vmem:[%s2336_s29 + $0xb8] sm:$0xff]  ;;  %v2446_v32 = vld [vmem:[%s2336_s29 + $0xb0] sm:$0xff] }
  0x1c   : > { %394 = vadd.xlane.f32.xlu1 %v393_v18  ;;  %388 = vadd.xlane.f32.xlu0 %v387_v19  ;;  %v408_v42 = vadd.f32 %v353_v37, %v352_v36  ;;  %v357_v45 = vunpack.c.h.bf16 %v2384_v39  ;;  %v362_v48 = vunpack.c.l.bf16 %v2391_v46  ;;  %v363_v49 = vunpack.c.h.bf16 %v2391_v46  ;;  %v2433_v19 = vld [vmem:[%s2336_s29 + $0xa8] sm:$0xff]  ;;  %3211 = vst [vmem:[#allocation2_spill] sm:$0xff] %v2443_v29 }
  0x1d   : > { %v417_v50 = vadd.f32 %v359_v43, %v358_v41  ;;  %v360_v52 = vunpack.c.l.bf16 %v2394_v47  ;;  %v361_v53 = vunpack.c.h.bf16 %v2394_v47  ;;  %v366_v57 = vunpack.c.l.bf16 %v2401_v54  ;;  %v482_v43 = vld [vmem:[%s3203_s1 + $0x8] sm:$0xff] }
  0x1e   : > { %v414_v51 = vadd.f32 %v357_v45, %v356_v44  ;;  %v423_v56 = vadd.f32 %v363_v49, %v362_v48  ;;  %v367_v58 = vunpack.c.h.bf16 %v2401_v54  ;;  %v364_v60 = vunpack.c.l.bf16 %v2404_v55  ;;  %v506_v44 = vld [vmem:[%s3203_s1 + $0xc8] sm:$0xff]  ;;  %1977 = vmatprep.mubr.msk.f32.mxu0 %vm553_vm0, %v482_v43 }
  0x1f   : > { %v420_v59 = vadd.f32 %v361_v53, %v360_v52  ;;  %v365_v61 = vunpack.c.h.bf16 %v2404_v55  ;;  %v2274_v1 = vmov 0.0|0.0   ;;  %v370_v3 = vunpack.c.l.bf16 %v2411_v62  ;;  %1989 = vmatprep.mubr.msk.f32.mxu1 %vm553_vm0, %v506_v44 }
  0x20   : > { %400 = vadd.xlane.f32.xlu1 %v399_v24  ;;  %397 = vadd.xlane.f32.xlu0 %v396_v26  ;;  %v371_v4 = vunpack.c.h.bf16 %v2411_v62  ;;  %v429_v5 = vadd.f32 %v367_v58, %v366_v57  ;;  %v368_v7 = vunpack.c.l.bf16 %v2414_v63  ;;  %v369_v9 = vunpack.c.h.bf16 %v2414_v63 }
  0x21   : > { %2027 = vmatprep.subr.bf16.mxu0 %v2274_v1  ;;  %2063 = vmatprep.subr.bf16.mxu1 %v2274_v1  ;;  %v426_v6 = vadd.f32 %v365_v61, %v364_v60  ;;  %v374_v14 = vunpack.c.l.bf16 %v2423_v10  ;;  %v375_v16 = vunpack.c.h.bf16 %v2423_v10  ;;  %v372_v17 = vunpack.c.l.bf16 %v2426_v11 }
  0x22   : > { %v435_v12 = vadd.f32 %v371_v4, %v370_v3  ;;  %v432_v15 = vadd.f32 %v369_v9, %v368_v7  ;;  %v373_v18 = vunpack.c.h.bf16 %v2426_v11  ;;  %v378_v21 = vunpack.c.l.bf16 %v2433_v19 }
  0x23   : > { %v379_v24 = vunpack.c.h.bf16 %v2433_v19  ;;  %v441_v25 = vadd.f32 %v375_v16, %v374_v14  ;;  %v376_v27 = vunpack.c.l.bf16 %v2436_v20  ;;  %v377_v28 = vunpack.c.h.bf16 %v2436_v20 }
  0x24   : > { %406 = vadd.xlane.f32.xlu1 %v405_v34  ;;  %403 = vadd.xlane.f32.xlu0 %v402_v35  ;;  %v438_v26 = vadd.f32 %v373_v18, %v372_v17  ;;  %v382_v34 = vunpack.c.l.bf16 %v2443_v29  ;;  %v383_v36 = vunpack.c.h.bf16 %v2443_v29  ;;  %v380_v37 = vunpack.c.l.bf16 %v2446_v32 }
  0x25   : > { %v447_v33 = vadd.f32 %v379_v24, %v378_v21  ;;  %v444_v35 = vadd.f32 %v377_v28, %v376_v27 }
  0x26   : > { %v453_v41 = vadd.f32 %v383_v36, %v382_v34 }
  0x28   : > { %412 = vadd.xlane.f32.xlu1 %v411_v40  ;;  %409 = vadd.xlane.f32.xlu0 %v408_v42  ;;  %v381_v40 = vunpack.c.h.bf16 %v2446_v32 }
  0x2a   : > { %v450_v42 = vadd.f32 %v381_v40, %v380_v37 }
  0x2c   : > { %418 = vadd.xlane.f32.xlu1 %v417_v50  ;;  %415 = vadd.xlane.f32.xlu0 %v414_v51 }
  0x30   : > { %424 = vadd.xlane.f32.xlu1 %v423_v56  ;;  %421 = vadd.xlane.f32.xlu0 %v420_v59 }
  0x34   : > { %430 = vadd.xlane.f32.xlu1 %v429_v5  ;;  %427 = vadd.xlane.f32.xlu0 %v426_v6 }
  0x38   : > { %436 = vadd.xlane.f32.xlu1 %v435_v12  ;;  %433 = vadd.xlane.f32.xlu0 %v432_v15 }
  0x3c   : > { %442 = vadd.xlane.f32.xlu1 %v441_v25  ;;  %439 = vadd.xlane.f32.xlu0 %v438_v26 }
  0x40   : > { %448 = vadd.xlane.f32.xlu1 %v447_v33  ;;  %445 = vadd.xlane.f32.xlu0 %v444_v35 }
  0x44   : > { %454 = vadd.xlane.f32.xlu1 %v453_v41  ;;  %451 = vadd.xlane.f32.xlu0 %v450_v42 }
  0xa5   : > { %v392_v45 = vpop.xlane.xlu1 %391  ;;  %v386_v48 = vpop.xlane.xlu0 %385 }
  0xa6   : > { %v457_v51 = vmul.f32 0.00390625, %v386_v48  ;;  %v459_v53 = vmul.f32 0.00390625, %v392_v45 }
  0xa9   : > { %v395_v49 = vpop.xlane.xlu1 %394  ;;  %v389_v50 = vpop.xlane.xlu0 %388 }
  0xaa   : > { %v458_v52 = vmul.f32 0.00390625, %v389_v50  ;;  %v460_v56 = vmul.f32 0.00390625, %v395_v49 }
  0xac   : > { %v2028_v57 = vpack.c.bf16 %v458_v52, %v457_v51  ;;  %v2031_v3 = vpack.c.bf16 %v460_v56, %v459_v53 }
  0xad   : > { %v401_v58 = vpop.xlane.xlu1 %400  ;;  %v398_v59 = vpop.xlane.xlu0 %397 }
  0xae   : > { %2029 = vmatpush1.bf16.msra.mxu0 %v2028_v57  ;;  %2075 = vmatpush1.bf16.msra.mxu1 %v2028_v57  ;;  %v462_v60 = vmul.f32 0.00390625, %v401_v58  ;;  %v461_v61 = vmul.f32 0.00390625, %v398_v59 }
  0xaf   : > { %2030 = vmatprep.subr.bf16.mxu0 %v2274_v1  ;;  %2064 = vmatprep.subr.bf16.mxu1 %v2274_v1 }
  0xb0   : > { %v2034_v6 = vpack.c.bf16 %v462_v60, %v461_v61 }
  0xb1   : > { %v407_v4 = vpop.xlane.xlu1 %406  ;;  %v404_v5 = vpop.xlane.xlu0 %403 }
  0xb2   : > { %2032 = vmatpush1.bf16.msra.mxu0 %v2031_v3  ;;  %2076 = vmatpush1.bf16.msra.mxu1 %v2031_v3  ;;  %v464_v7 = vmul.f32 0.00390625, %v407_v4  ;;  %v463_v9 = vmul.f32 0.00390625, %v404_v5 }
  0xb3   : > { %2033 = vmatprep.subr.bf16.mxu0 %v2274_v1  ;;  %2065 = vmatprep.subr.bf16.mxu1 %v2274_v1 }
  0xb4   : > { %v2037_v15 = vpack.c.bf16 %v464_v7, %v463_v9 }
  0xb5   : > { %v413_v12 = vpop.xlane.xlu1 %412  ;;  %v410_v14 = vpop.xlane.xlu0 %409 }
  0xb6   : > { %2035 = vmatpush1.bf16.msra.mxu0 %v2034_v6  ;;  %2077 = vmatpush1.bf16.msra.mxu1 %v2034_v6  ;;  %v466_v16 = vmul.f32 0.00390625, %v413_v12  ;;  %v465_v17 = vmul.f32 0.00390625, %v410_v14  ;;  %v481_v12 = vld [vmem:[%s3203_s1] sm:$0xff] }
  0xb7   : > { %2036 = vmatprep.subr.bf16.mxu0 %v2274_v1  ;;  %2066 = vmatprep.subr.bf16.mxu1 %v2274_v1  ;;  %v505_v14 = vld [vmem:[%s3203_s1 + $0xc0] sm:$0xff] }
  0xb8   : > { %v2040_v24 = vpack.c.bf16 %v466_v16, %v465_v17  ;;  %v508_v16 = vld [vmem:[%s3203_s1 + $0xd8] sm:$0xff]  ;;  %v507_v17 = vld [vmem:[%s3203_s1 + $0xd0] sm:$0xff] }
  0xb9   : > { %v419_v18 = vpop.xlane.xlu1 %418  ;;  %v416_v21 = vpop.xlane.xlu0 %415 }
  0xba   : > { %2038 = vmatpush1.bf16.msra.mxu0 %v2037_v15  ;;  %2078 = vmatpush1.bf16.msra.mxu1 %v2037_v15  ;;  %v468_v25 = vmul.f32 0.00390625, %v419_v18  ;;  %v467_v26 = vmul.f32 0.00390625, %v416_v21  ;;  %v484_v15 = vld [vmem:[%s3203_s1 + $0x18] sm:$0xff]  ;;  %v486_v18 = vld [vmem:[%s3203_s1 + $0x28] sm:$0xff] }
  0xbb   : > { %2039 = vmatprep.subr.bf16.mxu0 %v2274_v1  ;;  %2067 = vmatprep.subr.bf16.mxu1 %v2274_v1  ;;  %v510_v21 = vld [vmem:[%s3203_s1 + $0xe8] sm:$0xff] }
  0xbc   : > { %v2043_v33 = vpack.c.bf16 %v468_v25, %v467_v26  ;;  %v509_v25 = vld [vmem:[%s3203_s1 + $0xe0] sm:$0xff]  ;;  %v488_v26 = vld [vmem:[%s3203_s1 + $0x38] sm:$0xff] }
  0xbd   : > { %v425_v27 = vpop.xlane.xlu1 %424  ;;  %v422_v28 = vpop.xlane.xlu0 %421 }
  0xbe   : > { %2041 = vmatpush1.bf16.msra.mxu0 %v2040_v24  ;;  %2079 = vmatpush1.bf16.msra.mxu1 %v2040_v24  ;;  %v470_v34 = vmul.f32 0.00390625, %v425_v27  ;;  %v469_v35 = vmul.f32 0.00390625, %v422_v28  ;;  %v485_v24 = vld [vmem:[%s3203_s1 + $0x20] sm:$0xff]  ;;  %v512_v27 = vld [vmem:[%s3203_s1 + $0xf8] sm:$0xff]  ;;  %v487_v28 = vld [vmem:[%s3203_s1 + $0x30] sm:$0xff] }
  0xbf   : > { %2042 = vmatprep.subr.bf16.mxu0 %v2274_v1  ;;  %2068 = vmatprep.subr.bf16.mxu1 %v2274_v1 }
  0xc0   : > { %v2046_v40 = vpack.c.bf16 %v470_v34, %v469_v35  ;;  %v490_v34 = vld [vmem:[%s3203_s1 + $0x48] sm:$0xff] }
  0xc1   : > { %v431_v36 = vpop.xlane.xlu1 %430  ;;  %v428_v37 = vpop.xlane.xlu0 %427  ;;  %v514_v35 = vld [vmem:[%s3203_s1 + $0x108] sm:$0xff] }
  0xc2   : > { %2044 = vmatpush1.bf16.msra.mxu0 %v2043_v33  ;;  %2080 = vmatpush1.bf16.msra.mxu1 %v2043_v33  ;;  %v472_v41 = vmul.f32 0.00390625, %v431_v36  ;;  %v471_v42 = vmul.f32 0.00390625, %v428_v37  ;;  %v511_v33 = vld [vmem:[%s3203_s1 + $0xf0] sm:$0xff]  ;;  %v489_v36 = vld [vmem:[%s3203_s1 + $0x40] sm:$0xff] }
  0xc3   : > { %2045 = vmatprep.subr.bf16.mxu0 %v2274_v1  ;;  %2069 = vmatprep.subr.bf16.mxu1 %v2274_v1  ;;  %v513_v37 = vld [vmem:[%s3203_s1 + $0x100] sm:$0xff] }
  0xc4   : > { %v2049_v45 = vpack.c.bf16 %v472_v41, %v471_v42  ;;  %v516_v41 = vld [vmem:[%s3203_s1 + $0x118] sm:$0xff]  ;;  %v491_v42 = vld [vmem:[%s3203_s1 + $0x50] sm:$0xff] }
  0xc5   : > { %v437_v43 = vpop.xlane.xlu1 %436  ;;  %v434_v44 = vpop.xlane.xlu0 %433 }
  0xc6   : > { %2047 = vmatpush1.bf16.msra.mxu0 %v2046_v40  ;;  %2081 = vmatpush1.bf16.msra.mxu1 %v2046_v40  ;;  %v474_v48 = vmul.f32 0.00390625, %v437_v43  ;;  %v473_v49 = vmul.f32 0.00390625, %v434_v44  ;;  %v492_v40 = vld [vmem:[%s3203_s1 + $0x58] sm:$0xff]  ;;  %v515_v43 = vld [vmem:[%s3203_s1 + $0x110] sm:$0xff]  ;;  %v494_v44 = vld [vmem:[%s3203_s1 + $0x68] sm:$0xff] }
  0xc7   : > { %2048 = vmatprep.subr.bf16.mxu0 %v2274_v1  ;;  %2070 = vmatprep.subr.bf16.mxu1 %v2274_v1 }
  0xc8   : > { %v2052_v52 = vpack.c.bf16 %v474_v48, %v473_v49  ;;  %v493_v48 = vld [vmem:[%s3203_s1 + $0x60] sm:$0xff] }
  0xc9   : > { %v443_v50 = vpop.xlane.xlu1 %442  ;;  %v440_v51 = vpop.xlane.xlu0 %439  ;;  %v517_v49 = vld [vmem:[%s3203_s1 + $0x120] sm:$0xff] }
  0xca   : > { %2050 = vmatpush1.bf16.msra.mxu0 %v2049_v45  ;;  %2082 = vmatpush1.bf16.msra.mxu1 %v2049_v45  ;;  %v476_v53 = vmul.f32 0.00390625, %v443_v50  ;;  %v475_v56 = vmul.f32 0.00390625, %v440_v51  ;;  %v518_v45 = vld [vmem:[%s3203_s1 + $0x128] sm:$0xff]  ;;  %v496_v50 = vld [vmem:[%s3203_s1 + $0x78] sm:$0xff] }
  0xcb   : > { %2051 = vmatprep.subr.bf16.mxu0 %v2274_v1  ;;  %2071 = vmatprep.subr.bf16.mxu1 %v2274_v1  ;;  %v520_v51 = vld [vmem:[%s3203_s1 + $0x138] sm:$0xff] }
  0xcc   : > { %v2055_v59 = vpack.c.bf16 %v476_v53, %v475_v56  ;;  %v519_v53 = vld [vmem:[%s3203_s1 + $0x130] sm:$0xff]  ;;  %v498_v56 = vld [vmem:[%s3203_s1 + $0x88] sm:$0xff] }
  0xcd   : > { %v449_v57 = vpop.xlane.xlu1 %448  ;;  %v446_v58 = vpop.xlane.xlu0 %445 }
  0xce   : > { %2053 = vmatpush1.bf16.msra.mxu0 %v2052_v52  ;;  %2083 = vmatpush1.bf16.msra.mxu1 %v2052_v52  ;;  %v478_v60 = vmul.f32 0.00390625, %v449_v57  ;;  %v477_v61 = vmul.f32 0.00390625, %v446_v58  ;;  %v495_v52 = vld [vmem:[%s3203_s1 + $0x70] sm:$0xff]  ;;  %v522_v57 = vld [vmem:[%s3203_s1 + $0x148] sm:$0xff]  ;;  %v497_v58 = vld [vmem:[%s3203_s1 + $0x80] sm:$0xff] }
  0xcf   : > { %2054 = vmatprep.subr.bf16.mxu0 %v2274_v1  ;;  %2072 = vmatprep.subr.bf16.mxu1 %v2274_v1 }
  0xd0   : > { %v2058_v5 = vpack.c.bf16 %v478_v60, %v477_v61  ;;  %v500_v60 = vld [vmem:[%s3203_s1 + $0x98] sm:$0xff] }
  0xd1   : > { %v455_v3 = vpop.xlane.xlu1 %454  ;;  %v452_v4 = vpop.xlane.xlu0 %451  ;;  %v524_v61 = vld [vmem:[%s3203_s1 + $0x158] sm:$0xff] }
  0xd2   : > { %2056 = vmatpush1.bf16.msra.mxu0 %v2055_v59  ;;  %2084 = vmatpush1.bf16.msra.mxu1 %v2055_v59  ;;  %v480_v6 = vmul.f32 0.00390625, %v455_v3  ;;  %v479_v7 = vmul.f32 0.00390625, %v452_v4  ;;  %v521_v59 = vld [vmem:[%s3203_s1 + $0x140] sm:$0xff]  ;;  %v499_v3 = vld [vmem:[%s3203_s1 + $0x90] sm:$0xff] }
  0xd3   : > { %2057 = vmatprep.subr.bf16.mxu0 %v2274_v1  ;;  %2073 = vmatprep.subr.bf16.mxu1 %v2274_v1  ;;  %v523_v4 = vld [vmem:[%s3203_s1 + $0x150] sm:$0xff] }
  0xd4   : > { %v2061_v9 = vpack.c.bf16 %v480_v6, %v479_v7  ;;  %v526_v6 = vld [vmem:[%s3203_s1 + $0x168] sm:$0xff]  ;;  %v501_v7 = vld [vmem:[%s3203_s1 + $0xa0] sm:$0xff] }
  0xd6   : > { %2059 = vmatpush1.bf16.msra.mxu0 %v2058_v5  ;;  %2085 = vmatpush1.bf16.msra.mxu1 %v2058_v5  ;;  %v502_v5 = vld [vmem:[%s3203_s1 + $0xa8] sm:$0xff] }
  0xd7   : > { %2060 = vmatprep.subr.bf16.mxu0 %v2274_v1  ;;  %2074 = vmatprep.subr.bf16.mxu1 %v2274_v1  ;;  %v483_v1 = vld [vmem:[%s3203_s1 + $0x10] sm:$0xff] }
  0xda   : > { %2062 = vmatpush1.bf16.msra.mxu0 %v2061_v9  ;;  %2086 = vmatpush1.bf16.msra.mxu1 %v2061_v9  ;;  %v525_v9 = vld [vmem:[%s3203_s1 + $0x160] sm:$0xff] }
  0xdd   : > { %691 = vmatmul.mubr.f32.vlgmr.msra.gmra.mrb[0].mxu0 %v481_v12  ;;  %751 = vmatmul.mubr.f32.vlgmr.msra.gmra.mrb[0].mxu1 %v505_v14  ;;  %v504_v12 = vld [vmem:[%s3203_s1 + $0xb8] sm:$0xff] }
  0xde   : > { %1978 = vmatprep.mubr.msk.f32.mxu0 %vm553_vm0, %v484_v15  ;;  %1990 = vmatprep.mubr.msk.f32.mxu1 %vm553_vm0, %v508_v16  ;;  %v528_v14 = vld [vmem:[%s3203_s1 + $0x178] sm:$0xff]  ;;  %v503_v15 = vld [vmem:[%s3203_s1 + $0xb0] sm:$0xff] }
  0xdf   : > { %v527_v16 = vld [vmem:[%s3203_s1 + $0x170] sm:$0xff] }
  0xe1   : > { %696 = vmatmul.mubr.f32.gmra.mrb[2].mxu0 %v483_v1  ;;  %756 = vmatmul.mubr.f32.gmra.mrb[2].mxu1 %v507_v17  ;;  %v2275_v1 = vmov 0   ;;  %v529_v17 = vld [vmem:[%s3204_s2] sm:$0xff] }
  0xe2   : > { %1979 = vmatprep.mubr.msk.f32.mxu0 %vm553_vm0, %v486_v18  ;;  %1991 = vmatprep.mubr.msk.f32.mxu1 %vm553_vm0, %v510_v21  ;;  %v541_v18 = vld [vmem:[%s3204_s2 + $0x60] sm:$0xff] }
  0xe3   : > { %2105 = vset.pattern.permute.xlu1 %v2275_v1  ;;  %2104 = vset.pattern.permute.xlu0 %v2275_v1 }
  0xe5   : > { %701 = vmatmul.mubr.f32.gmra.mrb[4].mxu0 %v485_v24  ;;  %761 = vmatmul.mubr.f32.gmra.mrb[4].mxu1 %v509_v25 }
  0xe6   : > { %1980 = vmatprep.mubr.msk.f32.mxu0 %vm553_vm0, %v488_v26  ;;  %1992 = vmatprep.mubr.msk.f32.mxu1 %vm553_vm0, %v512_v27 }
  0xe9   : > { %706 = vmatmul.mubr.f32.gmra.mrb[6].mxu0 %v487_v28  ;;  %766 = vmatmul.mubr.f32.gmra.mrb[6].mxu1 %v511_v33  ;;  %v530_v33 = vld [vmem:[%s3204_s2 + $0x8] sm:$0xff] }
  0xea   : > { %1981 = vmatprep.mubr.msk.f32.mxu0 %vm553_vm0, %v490_v34  ;;  %1993 = vmatprep.mubr.msk.f32.mxu1 %vm553_vm0, %v514_v35  ;;  %v542_v34 = vld [vmem:[%s3204_s2 + $0x68] sm:$0xff] }
  0xed   : > { %711 = vmatmul.mubr.f32.gmra.mrb[8].mxu0 %v489_v36  ;;  %771 = vmatmul.mubr.f32.gmra.mrb[8].mxu1 %v513_v37 }
  0xee   : > { %1982 = vmatprep.mubr.msk.f32.mxu0 %vm553_vm0, %v492_v40  ;;  %1994 = vmatprep.mubr.msk.f32.mxu1 %vm553_vm0, %v516_v41 }
  0xf1   : > { %716 = vmatmul.mubr.f32.gmra.mrb[10].mxu0 %v491_v42  ;;  %776 = vmatmul.mubr.f32.gmra.mrb[10].mxu1 %v515_v43 }
  0xf2   : > { %1983 = vmatprep.mubr.msk.f32.mxu0 %vm553_vm0, %v494_v44  ;;  %1995 = vmatprep.mubr.msk.f32.mxu1 %vm553_vm0, %v518_v45  ;;  %v531_v45 = vld [vmem:[%s3204_s2 + $0x10] sm:$0xff] }
  0xf5   : > { %721 = vmatmul.mubr.f32.gmra.mrb[12].mxu0 %v493_v48  ;;  %781 = vmatmul.mubr.f32.gmra.mrb[12].mxu1 %v517_v49  ;;  %v543_v48 = vld [vmem:[%s3204_s2 + $0x70] sm:$0xff] }
  0xf6   : > { %1984 = vmatprep.mubr.msk.f32.mxu0 %vm553_vm0, %v496_v50  ;;  %1996 = vmatprep.mubr.msk.f32.mxu1 %vm553_vm0, %v520_v51 }
  0xf9   : > { %726 = vmatmul.mubr.f32.gmra.mrb[14].mxu0 %v495_v52  ;;  %786 = vmatmul.mubr.f32.gmra.mrb[14].mxu1 %v519_v53 }
  0xfa   : > { %1985 = vmatprep.mubr.msk.f32.mxu0 %vm553_vm0, %v498_v56  ;;  %1997 = vmatprep.mubr.msk.f32.mxu1 %vm553_vm0, %v522_v57 }
  0xfd   : > { %731 = vmatmul.mubr.f32.gmra.mrb[16].mxu0 %v497_v58  ;;  %791 = vmatmul.mubr.f32.gmra.mrb[16].mxu1 %v521_v59  ;;  %v532_v59 = vld [vmem:[%s3204_s2 + $0x18] sm:$0xff] }
  0xfe   : > { %1986 = vmatprep.mubr.msk.f32.mxu0 %vm553_vm0, %v500_v60  ;;  %1998 = vmatprep.mubr.msk.f32.mxu1 %vm553_vm0, %v524_v61  ;;  %v544_v60 = vld [vmem:[%s3204_s2 + $0x78] sm:$0xff] }
 0x101   : > { %736 = vmatmul.mubr.f32.gmra.mrb[18].mxu0 %v499_v3  ;;  %796 = vmatmul.mubr.f32.gmra.mrb[18].mxu1 %v523_v4 }
 0x102   : > { %1987 = vmatprep.mubr.msk.f32.mxu0 %vm553_vm0, %v502_v5  ;;  %1999 = vmatprep.mubr.msk.f32.mxu1 %vm553_vm0, %v526_v6 }
 0x105   : > { %741 = vmatmul.mubr.f32.gmra.mrb[20].mxu0 %v501_v7  ;;  %801 = vmatmul.mubr.f32.gmra.mrb[20].mxu1 %v525_v9 }
 0x106   : > { %1988 = vmatprep.mubr.msk.f32.mxu0 %vm553_vm0, %v504_v12  ;;  %2000 = vmatprep.mubr.msk.f32.mxu1 %vm553_vm0, %v528_v14  ;;  %v533_v14 = vld [vmem:[%s3204_s2 + $0x20] sm:$0xff] }
 0x109   : > { %746 = vmatmul.mubr.f32.gmra.mrb[22].mxu0 %v503_v15  ;;  %806 = vmatmul.mubr.f32.gmra.mrb[22].mxu1 %v527_v16 }
 0x1b0   : > { %v692_v21 = vpop.f32.mrb[0].mxu0  ;;  %v752_v24 = vpop.f32.mrb[0].mxu1 }
 0x1b1   : > { %v693_v25 = vadd.f32 %v692_v21, %v529_v17  ;;  %v753_v26 = vadd.f32 %v752_v24, %v541_v18  ;;  %v694_v27 = vpop.f32.mrb[1].mxu0  ;;  %v754_v28 = vpop.f32.mrb[1].mxu1 }
 0x1b3   : > { %v811_v35 = vmax.f32 %v693_v25, 0.0  ;;  %v823_v36 = vmax.f32 %v753_v26, 0.0  ;;  %v545_v25 = vld [vmem:[%s3204_s2 + $0x80] sm:$0xff]  ;;  %v546_v26 = vld [vmem:[%s3204_s2 + $0x88] sm:$0xff] }
 0x1b4   : > { %v697_v37 = vpop.f32.mrb[2].mxu0  ;;  %v757_v40 = vpop.f32.mrb[2].mxu1 }
 0x1b5   : > { %v698_v41 = vadd.f32 %v697_v37, %v530_v33  ;;  %921 = vperm.xlu1 %2105, %v823_v36   ;;  %v699_v42 = vpop.f32.mrb[3].mxu0  ;;  %861 = vperm.xlu0 %2104, %v811_v35   ;;  %v758_v43 = vadd.f32 %v757_v40, %v542_v34  ;;  %v759_v44 = vpop.f32.mrb[3].mxu1  ;;  %v534_v40 = vld [vmem:[%s3204_s2 + $0x28] sm:$0xff] }
 0x1b7   : > { %v812_v49 = vmax.f32 %v698_v41, 0.0  ;;  %v824_v50 = vmax.f32 %v758_v43, 0.0 }
 0x1b8   : > { %v702_v51 = vpop.f32.mrb[4].mxu0  ;;  %v762_v52 = vpop.f32.mrb[4].mxu1 }
 0x1b9   : > { %v703_v53 = vadd.f32 %v702_v51, %v531_v45  ;;  %v704_v56 = vpop.f32.mrb[5].mxu0  ;;  %866 = vperm.xlu1 %2105, %v812_v49   ;;  %v763_v57 = vadd.f32 %v762_v52, %v543_v48  ;;  %v764_v58 = vpop.f32.mrb[5].mxu1  ;;  %926 = vperm.xlu0 %2104, %v824_v50   ;;  %v548_v50 = vld [vmem:[%s3204_s2 + $0x98] sm:$0xff]  ;;  %v535_v51 = vld [vmem:[%s3204_s2 + $0x30] sm:$0xff] }
 0x1bb   : > { %v813_v61 = vmax.f32 %v703_v53, 0.0  ;;  %v825_v5 = vmax.f32 %v763_v57, 0.0 }
 0x1bc   : > { %v707_v3 = vpop.f32.mrb[6].mxu0  ;;  %v767_v4 = vpop.f32.mrb[6].mxu1 }
 0x1bd   : > { %871 = vperm.xlu1 %2105, %v813_v61   ;;  %v708_v6 = vadd.f32 %v707_v3, %v532_v59  ;;  %v709_v7 = vpop.f32.mrb[7].mxu0  ;;  %v768_v9 = vadd.f32 %v767_v4, %v544_v60  ;;  %v769_v12 = vpop.f32.mrb[7].mxu1  ;;  %v547_v61 = vld [vmem:[%s3204_s2 + $0x90] sm:$0xff] }
 0x1bf   : > { %v826_v15 = vmax.f32 %v768_v9, 0.0  ;;  %v814_v17 = vmax.f32 %v708_v6, 0.0 }
 0x1c0   : > { %v772_v16 = vpop.f32.mrb[8].mxu1  ;;  %v712_v1 = vpop.f32.mrb[8].mxu0 }
 0x1c1   : > { %931 = vperm.xlu1 %2105, %v825_v5   ;;  %v713_v18 = vadd.f32 %v712_v1, %v533_v14  ;;  %v774_v21 = vpop.f32.mrb[9].mxu1  ;;  %v714_v24 = vpop.f32.mrb[9].mxu0  ;;  %936 = vperm.xlu0 %2104, %v826_v15   ;;  %v773_v33 = vadd.f32 %v772_v16, %v545_v25  ;;  %v536_v14 = vld [vmem:[%s3204_s2 + $0x38] sm:$0xff]  ;;  %v538_v15 = vld [vmem:[%s3204_s2 + $0x48] sm:$0xff] }
 0x1c2   : > { %v550_v16 = vld [vmem:[%s3204_s2 + $0xa8] sm:$0xff] }
 0x1c3   : > { %v815_v34 = vmax.f32 %v713_v18, 0.0  ;;  %v827_v44 = vmax.f32 %v773_v33, 0.0 }
 0x1c4   : > { %v777_v27 = vpop.f32.mrb[10].mxu1  ;;  %v717_v28 = vpop.f32.mrb[10].mxu0 }
 0x1c5   : > { %v778_v35 = vadd.f32 %v777_v27, %v546_v26  ;;  %876 = vperm.xlu1 %2105, %v814_v17   ;;  %v779_v36 = vpop.f32.mrb[11].mxu1  ;;  %v719_v37 = vpop.f32.mrb[11].mxu0  ;;  %v718_v45 = vadd.f32 %v717_v28, %v534_v40  ;;  %v537_v28 = vld [vmem:[%s3204_s2 + $0x40] sm:$0xff] }
 0x1c7   : > { %v828_v41 = vmax.f32 %v778_v35, 0.0  ;;  %v816_v56 = vmax.f32 %v718_v45, 0.0  ;;  %v552_v45 = vld [vmem:[%s3204_s2 + $0xb8] sm:$0xff] }
 0x1c8   : > { %v782_v42 = vpop.f32.mrb[12].mxu1  ;;  %v722_v43 = vpop.f32.mrb[12].mxu0 }
 0x1c9   : > { %881 = vperm.xlu1 %2105, %v815_v34   ;;  %946 = vperm.xlu0 %2104, %v828_v41   ;;  %v784_v48 = vpop.f32.mrb[13].mxu1  ;;  %v724_v49 = vpop.f32.mrb[13].mxu0  ;;  %v723_v58 = vadd.f32 %v722_v43, %v535_v51  ;;  %v783_v6 = vadd.f32 %v782_v42, %v547_v61  ;;  %v549_v43 = vld [vmem:[%s3204_s2 + $0xa0] sm:$0xff] }
 0x1cb   : > { %v817_v7 = vmax.f32 %v723_v58, 0.0  ;;  %v829_v18 = vmax.f32 %v783_v6, 0.0  ;;  %v539_v58 = vld [vmem:[%s3204_s2 + $0x50] sm:$0xff] }
 0x1cc   : > { %v787_v52 = vpop.f32.mrb[14].mxu1  ;;  %v727_v53 = vpop.f32.mrb[14].mxu0 }
 0x1cd   : > { %v788_v57 = vadd.f32 %v787_v52, %v548_v50  ;;  %941 = vperm.xlu1 %2105, %v827_v44   ;;  %v729_v59 = vpop.f32.mrb[15].mxu0  ;;  %v789_v60 = vpop.f32.mrb[15].mxu1  ;;  %v728_v21 = vadd.f32 %v727_v53, %v536_v14  ;;  %v540_v44 = vld [vmem:[%s3204_s2 + $0x58] sm:$0xff] }
 0x1cf   : > { %v830_v3 = vmax.f32 %v788_v57, 0.0  ;;  %v818_v36 = vmax.f32 %v728_v21, 0.0 }
 0x1d0   : > { %v732_v4 = vpop.f32.mrb[16].mxu0  ;;  %v792_v5 = vpop.f32.mrb[16].mxu1 }
 0x1d1   : > { %886 = vperm.xlu1 %2105, %v816_v56   ;;  %956 = vperm.xlu0 %2104, %v830_v3   ;;  %v734_v9 = vpop.f32.mrb[17].mxu0  ;;  %v794_v12 = vpop.f32.mrb[17].mxu1  ;;  %v733_v37 = vadd.f32 %v732_v4, %v537_v28  ;;  %v793_v51 = vadd.f32 %v792_v5, %v549_v43  ;;  %v551_v4 = vld [vmem:[%s3204_s2 + $0xb0] sm:$0xff] }
 0x1d2   : > { %v1051_v9 = vld [vmem:[%s2718_s13] sm:$0xff] }
 0x1d3   : > { %v819_v50 = vmax.f32 %v733_v37, 0.0  ;;  %v831_v60 = vmax.f32 %v793_v51, 0.0  ;;  %v1063_v12 = vld [vmem:[%s2718_s13 + $0x60] sm:$0xff]  ;;  %v1075_v14 = vadd.f32 1e-10, %v1051_v9 }
 0x1d4   : > { %v737_v1 = vpop.f32.mrb[18].mxu0  ;;  %v797_v17 = vpop.f32.mrb[18].mxu1  ;;  %v1067_v37 = vld [vmem:[%s2718_s13 + $0x80] sm:$0xff] }
 0x1d5   : > { %v738_v24 = vadd.f32 %v737_v1, %v538_v15  ;;  %891 = vperm.xlu1 %2105, %v817_v7   ;;  %v798_v25 = vadd.f32 %v797_v17, %v550_v16  ;;  %v739_v26 = vpop.f32.mrb[19].mxu0  ;;  %v799_v27 = vpop.f32.mrb[19].mxu1  ;;  %v1052_v15 = vld [vmem:[%s2718_s13 + $0x8] sm:$0xff]  ;;  %v1087_v16 = vadd.f32 1e-10, %v1063_v12  ;;  %2168 = vlog2.f32 %v1075_v14 }
 0x1d6   : > { %v1076_v1 = vadd.f32 1e-10, %v1052_v15  ;;  %v1064_v17 = vld [vmem:[%s2718_s13 + $0x68] sm:$0xff]  ;;  %v1054_v27 = vld [vmem:[%s2718_s13 + $0x18] sm:$0xff] }
 0x1d7   : > { %v820_v33 = vmax.f32 %v738_v24, 0.0  ;;  %v832_v40 = vmax.f32 %v798_v25, 0.0  ;;  %2170 = vlog2.f32 %v1087_v16  ;;  %v1088_v21 = vadd.f32 1e-10, %v1064_v17  ;;  %v1065_v25 = vld [vmem:[%s2718_s13 + $0x70] sm:$0xff] }
 0x1d8   : > { %v742_v34 = vpop.f32.mrb[20].mxu0  ;;  %v802_v35 = vpop.f32.mrb[20].mxu1  ;;  %2172 = vlog2.f32 %v1076_v1  ;;  %v1089_v26 = vadd.f32 1e-10, %v1065_v25  ;;  %v1078_v28 = vadd.f32 1e-10, %v1054_v27 }
 0x1d9   : > { %951 = vperm.xlu1 %2105, %v829_v18   ;;  %906 = vperm.xlu0 %2104, %v820_v33   ;;  %v744_v41 = vpop.f32.mrb[21].mxu0  ;;  %v804_v42 = vpop.f32.mrb[21].mxu1  ;;  %v743_v61 = vadd.f32 %v742_v34, %v539_v58  ;;  %v803_v6 = vadd.f32 %v802_v35, %v551_v4  ;;  %v1053_v18 = vld [vmem:[%s2718_s13 + $0x10] sm:$0xff]  ;;  %2174 = vlog2.f32 %v1088_v21  ;;  %v1055_v33 = vld [vmem:[%s2718_s13 + $0x20] sm:$0xff]  ;;  %v1066_v35 = vld [vmem:[%s2718_s13 + $0x78] sm:$0xff] }
 0x1da   : > { %v1077_v24 = vadd.f32 1e-10, %v1053_v18  ;;  %v1090_v43 = vadd.f32 1e-10, %v1066_v35  ;;  %v1069_v18 = vld [vmem:[%s2718_s13 + $0x90] sm:$0xff] }
 0x1db   : > { %v821_v5 = vmax.f32 %v743_v61, 0.0  ;;  %v833_v7 = vmax.f32 %v803_v6, 0.0 }
 0x1dc   : > { %v747_v48 = vpop.f32.mrb[22].mxu0  ;;  %v807_v49 = vpop.f32.mrb[22].mxu1  ;;  %2176 = vlog2.f32 %v1077_v24 }
 0x1dd   : > { %v748_v52 = vadd.f32 %v747_v48, %v540_v44  ;;  %896 = vperm.xlu1 %2105, %v818_v36   ;;  %966 = vperm.xlu0 %2104, %v832_v40   ;;  %v808_v53 = vadd.f32 %v807_v49, %v552_v45  ;;  %v749_v56 = vpop.f32.mrb[23].mxu0  ;;  %v809_v57 = vpop.f32.mrb[23].mxu1  ;;  %2178 = vlog2.f32 %v1089_v26  ;;  %v1079_v40 = vadd.f32 1e-10, %v1055_v33 }
 0x1de   : > { %2180 = vlog2.f32 %v1078_v28  ;;  %v1091_v45 = vadd.f32 1e-10, %v1067_v37  ;;  %v1093_v28 = vadd.f32 1e-10, %v1069_v18 }
 0x1df   : > { %v822_v59 = vmax.f32 %v748_v52, 0.0  ;;  %v834_v3 = vmax.f32 %v808_v53, 0.0  ;;  %v2169_v34 = vpop.eup %2168  ;;  %2182 = vlog2.f32 %v1079_v40 }
 0x1e0   : > { %v1100_v42 = vmul.f32 0.6931472, %v2169_v34  ;;  %2184 = vlog2.f32 %v1090_v43  ;;  %v847_v43 = vld [vmem:[%s3205_s3 + $0x60] sm:$0xff] }
 0x1e1   : > { %901 = vperm.xlu1 %2105, %v819_v50   ;;  %916 = vperm.xlu0 %2104, %v822_v59   ;;  %v2171_v36 = vpop.eup %2170  ;;  %v1056_v50 = vld [vmem:[%s2718_s13 + $0x28] sm:$0xff]  ;;  %2186 = vlog2.f32 %v1091_v45 }
 0x1e2   : > { %v2173_v41 = vpop.eup %2172  ;;  %v1124_v44 = vmul.f32 0.6931472, %v2171_v36  ;;  %v1147_v52 = vsub.f32 1e-10, %v1100_v42  ;;  %v1080_v57 = vadd.f32 1e-10, %v1056_v50 }
 0x1e3   : > { %v2175_v48 = vpop.eup %2174  ;;  %v1102_v49 = vmul.f32 0.6931472, %v2173_v41  ;;  %v1058_v36 = vld [vmem:[%s2718_s13 + $0x38] sm:$0xff]  ;;  %v1059_v42 = vld [vmem:[%s2718_s13 + $0x40] sm:$0xff] }
 0x1e4   : > { %v1159_v53 = vsub.f32 1e-10, %v1124_v44  ;;  %v1126_v56 = vmul.f32 0.6931472, %v2175_v48  ;;  %2188 = vlog2.f32 %v1147_v52  ;;  %v835_v44 = vld [vmem:[%s3205_s3] sm:$0xff] }
 0x1e5   : > { %961 = vperm.xlu1 %2105, %v831_v60   ;;  %976 = vperm.xlu0 %2104, %v834_v3   ;;  %v1148_v59 = vsub.f32 1e-10, %v1102_v49  ;;  %v1082_v50 = vadd.f32 1e-10, %v1058_v36 }
 0x1e6   : > { %v2177_v51 = vpop.eup %2176  ;;  %2190 = vlog2.f32 %v1159_v53  ;;  %v1160_v3 = vsub.f32 1e-10, %v1126_v56  ;;  %v1003_v56 = vld [vmem:[%s3206_s4] sm:$0xff] }
 0x1e7   : > { %v2179_v58 = vpop.eup %2178  ;;  %v1104_v60 = vmul.f32 0.6931472, %v2177_v51  ;;  %2192 = vlog2.f32 %v1080_v57  ;;  %v1070_v51 = vld [vmem:[%s2718_s13 + $0x98] sm:$0xff] }
 0x1e8   : > { %v2181_v61 = vpop.eup %2180  ;;  %v1128_v4 = vmul.f32 0.6931472, %v2179_v58  ;;  %2194 = vlog2.f32 %v1148_v59  ;;  %v1083_v59 = vadd.f32 1e-10, %v1059_v42 }
 0x1e9   : > { %911 = vperm.xlu1 %2105, %v821_v5   ;;  %v1068_v5 = vld [vmem:[%s2718_s13 + $0x88] sm:$0xff]  ;;  %v1149_v6 = vsub.f32 1e-10, %v1104_v60  ;;  %v2183_v9 = vpop.eup %2182  ;;  %v1106_v12 = vmul.f32 0.6931472, %v2181_v61  ;;  %2196 = vlog2.f32 %v1160_v3  ;;  %v1015_v61 = vld [vmem:[%s3206_s4 + $0x60] sm:$0xff] }
 0x1ea   : > { %v1092_v14 = vadd.f32 1e-10, %v1068_v5  ;;  %v2185_v15 = vpop.eup %2184  ;;  %v1161_v16 = vsub.f32 1e-10, %v1128_v4  ;;  %v1108_v21 = vmul.f32 0.6931472, %v2183_v9 }
 0x1eb   : > { %v2187_v1 = vpop.eup %2186  ;;  %2198 = vlog2.f32 %v1149_v6  ;;  %v1150_v24 = vsub.f32 1e-10, %v1106_v12  ;;  %v1130_v25 = vmul.f32 0.6931472, %v2185_v15  ;;  %v1071_v6 = vld [vmem:[%s2718_s13 + $0xa0] sm:$0xff]  ;;  %v836_v9 = vld [vmem:[%s3205_s3 + $0x8] sm:$0xff] }
 0x1ec   : > { %2200 = vlog2.f32 %v1092_v14  ;;  %v1132_v27 = vmul.f32 0.6931472, %v2187_v1  ;;  %v1151_v35 = vsub.f32 1e-10, %v1108_v21  ;;  %v1004_v12 = vld [vmem:[%s3206_s4 + $0x8] sm:$0xff] }
 0x1ed   : > { %971 = vperm.xlu1 %2105, %v833_v7   ;;  %v1057_v7 = vld [vmem:[%s2718_s13 + $0x30] sm:$0xff]  ;;  %2202 = vlog2.f32 %v1161_v16  ;;  %v1162_v41 = vsub.f32 1e-10, %v1130_v25  ;;  %v848_v14 = vld [vmem:[%s3205_s3 + $0x68] sm:$0xff]  ;;  %v1094_v16 = vadd.f32 1e-10, %v1070_v51 }
 0x1ee   : > { %v1081_v17 = vadd.f32 1e-10, %v1057_v7  ;;  %v2189_v26 = vpop.eup %2188  ;;  %v1163_v48 = vsub.f32 1e-10, %v1132_v27  ;;  %v2276_v7 = vmov 1   ;;  %v1016_v27 = vld [vmem:[%s3206_s4 + $0x68] sm:$0xff] }
 0x1ef   : > { %v1172_v40 = vmul.f32 0.6931472, %v2189_v26  ;;  %2116 = vset.pattern.permute.xlu0 %v2276_v7 }
 0x1f0   : > { %v2191_v33 = vpop.eup %2190  ;;  %2204 = vlog2.f32 %v1081_v17 }
 0x1f1   : > { %v2193_v34 = vpop.eup %2192  ;;  %2206 = vlog2.f32 %v1150_v24  ;;  %v2742_v45 = vmul.f32 0.6931472, %v2191_v33  ;;  %v1219_v5 = vsub.f32 0.0, %v1172_v40  ;;  %2117 = vset.pattern.permute.xlu1 %v2276_v7  ;;  %v1060_v24 = vld [vmem:[%s2718_s13 + $0x48] sm:$0xff] }
 0x1f2   : > { %v2195_v37 = vpop.eup %2194  ;;  %2208 = vlog2.f32 %v1093_v28  ;;  %v1110_v49 = vmul.f32 0.6931472, %v2193_v34 }
 0x1f3   : > { %v2197_v52 = vpop.eup %2196  ;;  %v1174_v58 = vmul.f32 0.6931472, %v2195_v37  ;;  %2210 = vlog2.f32 %v1151_v35  ;;  %v1231_v15 = vsub.f32 0.0, %v2742_v45  ;;  %v1095_v35 = vadd.f32 1e-10, %v1071_v6 }
 0x1f4   : > { %2212 = vlog2.f32 %v1162_v41  ;;  %v1198_v18 = vmul.f32 0.6931472, %v2197_v52  ;;  %v1152_v21 = vsub.f32 1e-10, %v1110_v49  ;;  %v1084_v45 = vadd.f32 1e-10, %v1060_v24 }
 0x1f5   : > { %v2199_v60 = vpop.eup %2198  ;;  %2214 = vlog2.f32 %v1163_v48  ;;  %v1220_v33 = vsub.f32 0.0, %v1174_v58  ;;  %v1061_v48 = vld [vmem:[%s2718_s13 + $0x50] sm:$0xff] }
 0x1f6   : > { %v2201_v1 = vpop.eup %2200  ;;  %2216 = vlog2.f32 %v1082_v50  ;;  %v1176_v34 = vmul.f32 0.6931472, %v2199_v60  ;;  %v1232_v52 = vsub.f32 0.0, %v1198_v18  ;;  %v1085_v6 = vadd.f32 1e-10, %v1061_v48  ;;  %v1073_v24 = vld [vmem:[%s2718_s13 + $0xb0] sm:$0xff] }
 0x1f7   : > { %v2203_v25 = vpop.eup %2202  ;;  %2218 = vlog2.f32 %v1083_v59 }
 0x1f8   : > { %2220 = vlog2.f32 %v1094_v16  ;;  %v1221_v59 = vsub.f32 0.0, %v1176_v34  ;;  %v1200_v60 = vmul.f32 0.6931472, %v2203_v25  ;;  %v1062_v16 = vld [vmem:[%s2718_s13 + $0x58] sm:$0xff] }
 0x1f9   : > { %2222 = vlog2.f32 %v1152_v21 }
 0x1fa   : > { %v2205_v36 = vpop.eup %2204  ;;  %2224 = vlog2.f32 %v1095_v35 }
 0x1fb   : > { %v2207_v49 = vpop.eup %2206  ;;  %2226 = vlog2.f32 %v1084_v45  ;;  %v1097_v45 = vadd.f32 1e-10, %v1073_v24 }
 0x1fc   : > { %v1178_v18 = vmul.f32 0.6931472, %v2207_v49  ;;  %2228 = vlog2.f32 %v1085_v6  ;;  %v1006_v49 = vld [vmem:[%s3206_s4 + $0x18] sm:$0xff] }
 0x234   : > { %v922_v53 = vpop.permute.xlu1 %921  ;;  %v862_v57 = vpop.permute.xlu0 %861 }
 0x235   : > { %v991_v3 = vmul.f32 %v922_v53, %v847_v43  ;;  %v979_v4 = vmul.f32 %v862_v57, %v835_v44  ;;  %v837_v43 = vld [vmem:[%s3205_s3 + $0x10] sm:$0xff]  ;;  %v1134_v44 = vmul.f32 0.6931472, %v2201_v1  ;;  %v1072_v53 = vld [vmem:[%s2718_s13 + $0xa8] sm:$0xff] }
 0x236   : > { %v1005_v57 = vld [vmem:[%s3206_s4 + $0x10] sm:$0xff] }
 0x237   : > { %v1027_v17 = vadd.f32 %v1003_v56, %v979_v4  ;;  %v1039_v37 = vadd.f32 %v1015_v61, %v991_v3  ;;  %v2209_v56 = vpop.eup %2208  ;;  %v1112_v61 = vmul.f32 0.6931472, %v2205_v36 }
 0x238   : > { %v867_v26 = vpop.permute.xlu1 %866  ;;  %v927_v28 = vpop.permute.xlu0 %926  ;;  %v1136_v21 = vmul.f32 0.6931472, %v2209_v56 }
 0x239   : > { %v980_v40 = vmul.f32 %v867_v26, %v836_v9  ;;  %v2766_v41 = vadd.f32 %v1219_v5, %v1027_v17  ;;  %v992_v42 = vmul.f32 %v927_v28, %v848_v14  ;;  %v2780_v5 = vadd.f32 %v1231_v15, %v1039_v37  ;;  %v2211_v7 = vpop.eup %2210  ;;  %v849_v9 = vld [vmem:[%s3205_s3 + $0x70] sm:$0xff] }
 0x23a   : > { %v1096_v14 = vadd.f32 1e-10, %v1072_v53  ;;  %v2213_v1 = vpop.eup %2212  ;;  %v1017_v26 = vld [vmem:[%s3206_s4 + $0x70] sm:$0xff]  ;;  %v1233_v28 = vsub.f32 0.0, %v1200_v60  ;;  %v1086_v37 = vadd.f32 1e-10, %v1062_v16 }
 0x23b   : > { %v1028_v50 = vadd.f32 %v1004_v12, %v980_v40  ;;  %1291 = vrot.lane.b32.xlu1 %v2766_v41, %s2277_s12  ;;  %v1040_v51 = vadd.f32 %v1016_v27, %v992_v42  ;;  %v1164_v12 = vsub.f32 1e-10, %v1134_v44  ;;  %v2215_v25 = vpop.eup %2214  ;;  %v838_v42 = vld [vmem:[%s3205_s3 + $0x18] sm:$0xff] }
 0x23c   : > { %v872_v58 = vpop.permute.xlu1 %871  ;;  %v2217_v34 = vpop.eup %2216  ;;  %2230 = vlog2.f32 %v1096_v14  ;;  %v1018_v14 = vld [vmem:[%s3206_s4 + $0x78] sm:$0xff] }
 0x23d   : > { %v981_v3 = vmul.f32 %v872_v58, %v837_v43  ;;  %v2778_v4 = vadd.f32 %v1220_v33, %v1028_v50  ;;  %v2790_v15 = vadd.f32 %v1232_v52, %v1040_v51  ;;  %v1153_v33 = vsub.f32 1e-10, %v1112_v61  ;;  %v2219_v40 = vpop.eup %2218  ;;  %v850_v43 = vld [vmem:[%s3205_s3 + $0x78] sm:$0xff] }
 0x23e   : > { %v1222_v50 = vsub.f32 0.0, %v1178_v18  ;;  %2232 = vlog2.f32 %v1164_v12  ;;  %v1165_v51 = vsub.f32 1e-10, %v1136_v21  ;;  %v1074_v52 = vld [vmem:[%s2718_s13 + $0xb8] sm:$0xff]  ;;  %v2221_v53 = vpop.eup %2220  ;;  %v1202_v58 = vmul.f32 0.6931472, %v2213_v1 }
 0x23f   : > { %v1029_v17 = vadd.f32 %v1005_v57, %v981_v3  ;;  %1293 = vrot.lane.b32.xlu0 %v2778_v4, %s2277_s12  ;;  %1315 = vrot.lane.b32.xlu1 %v2780_v5, %s2277_s12  ;;  %v1180_v57 = vmul.f32 0.6931472, %v2211_v7  ;;  %2234 = vlog2.f32 %v1153_v33  ;;  %v2223_v60 = vpop.eup %2222  ;;  %v839_v12 = vld [vmem:[%s3205_s3 + $0x20] sm:$0xff]  ;;  %v1116_v16 = vmul.f32 0.6931472, %v2219_v40 }
 0x240   : > { %v932_v27 = vpop.permute.xlu1 %931  ;;  %v937_v44 = vpop.permute.xlu0 %936  ;;  %2236 = vlog2.f32 %v1086_v37  ;;  %v1098_v7 = vadd.f32 1e-10, %v1074_v52  ;;  %v1007_v21 = vld [vmem:[%s3206_s4 + $0x20] sm:$0xff]  ;;  %v1204_v37 = vmul.f32 0.6931472, %v2215_v25 }
 0x241   : > { %v993_v35 = vmul.f32 %v932_v27, %v849_v9  ;;  %v2796_v36 = vadd.f32 %v1221_v59, %v1029_v17  ;;  %v1114_v59 = vmul.f32 0.6931472, %v2217_v34  ;;  %v994_v3 = vmul.f32 %v937_v44, %v850_v43  ;;  %v2225_v9 = vpop.eup %2224  ;;  %v851_v40 = vld [vmem:[%s3205_s3 + $0x80] sm:$0xff] }
 0x242   : > { %2238 = vlog2.f32 %v1097_v45  ;;  %v1138_v17 = vmul.f32 0.6931472, %v2221_v53  ;;  %v2227_v18 = vpop.eup %2226  ;;  %v1234_v27 = vsub.f32 0.0, %v1202_v58  ;;  %v1140_v43 = vmul.f32 0.6931472, %v2225_v9 }
 0x243   : > { %v1041_v48 = vadd.f32 %v1017_v26, %v993_v35  ;;  %1295 = vrot.lane.b32.xlu1 %v2796_v36, %s2277_s12  ;;  %1317 = vrot.lane.b32.xlu0 %v2790_v15, %s2277_s12  ;;  %2240 = vlog2.f32 %v1165_v51  ;;  %v1223_v26 = vsub.f32 0.0, %v1180_v57  ;;  %v1042_v33 = vadd.f32 %v1018_v14, %v994_v3  ;;  %v2229_v44 = vpop.eup %2228  ;;  %v852_v3 = vld [vmem:[%s3205_s3 + $0x88] sm:$0xff] }
 0x244   : > { %v877_v56 = vpop.permute.xlu1 %876  ;;  %2242 = vlog2.f32 %v1098_v7  ;;  %v1182_v52 = vmul.f32 0.6931472, %v2223_v60  ;;  %v840_v14 = vld [vmem:[%s3205_s3 + $0x28] sm:$0xff]  ;;  %v1167_v60 = vsub.f32 1e-10, %v1140_v43  ;;  %v841_v43 = vld [vmem:[%s3205_s3 + $0x30] sm:$0xff] }
 0x245   : > { %v982_v61 = vmul.f32 %v877_v56, %v838_v42  ;;  %v2812_v6 = vadd.f32 %v1233_v28, %v1041_v48  ;;  %v1154_v28 = vsub.f32 1e-10, %v1114_v59  ;;  %v1155_v42 = vsub.f32 1e-10, %v1116_v16 }
 0x246   : > { %v1166_v48 = vsub.f32 1e-10, %v1138_v17  ;;  %v2231_v51 = vpop.eup %2230  ;;  %v2837_v58 = vadd.f32 %v1234_v27, %v1042_v33  ;;  %v1235_v59 = vsub.f32 0.0, %v1204_v37 }
 0x247   : > { %v1030_v1 = vadd.f32 %v1006_v49, %v982_v61  ;;  %1319 = vrot.lane.b32.xlu1 %v2812_v6, %s2277_s12  ;;  %v1118_v49 = vmul.f32 0.6931472, %v2227_v18  ;;  %2244 = vlog2.f32 %v1154_v28  ;;  %v1142_v17 = vmul.f32 0.6931472, %v2231_v51 }
 0x248   : > { %v882_v24 = vpop.permute.xlu1 %881  ;;  %v2233_v53 = vpop.eup %2232  ;;  %2246 = vlog2.f32 %v1155_v42  ;;  %v1020_v42 = vld [vmem:[%s3206_s4 + $0x88] sm:$0xff] }
 0x249   : > { %v983_v34 = vmul.f32 %v882_v24, %v839_v12  ;;  %v2825_v35 = vadd.f32 %v1222_v50, %v1030_v1  ;;  %v1019_v50 = vld [vmem:[%s3206_s4 + $0x80] sm:$0xff]  ;;  %v2235_v61 = vpop.eup %2234  ;;  %v947_v9 = vpop.permute.xlu0 %946  ;;  %v1120_v12 = vmul.f32 0.6931472, %v2229_v44  ;;  %2248 = vlog2.f32 %v1166_v48 }
 0x24a   : > { %v2237_v16 = vpop.eup %2236  ;;  %v1156_v1 = vsub.f32 1e-10, %v1118_v49  ;;  %v1206_v27 = vmul.f32 0.6931472, %v2233_v53  ;;  %v996_v33 = vmul.f32 %v947_v9, %v852_v3  ;;  %2250 = vlog2.f32 %v1167_v60 }
 0x24b   : > { %v1031_v45 = vadd.f32 %v1007_v21, %v983_v34  ;;  %1297 = vrot.lane.b32.xlu0 %v2825_v35, %s2277_s12  ;;  %v1008_v21 = vld [vmem:[%s3206_s4 + $0x28] sm:$0xff]  ;;  %v1157_v44 = vsub.f32 1e-10, %v1120_v12  ;;  %v1168_v49 = vsub.f32 1e-10, %v1142_v17  ;;  %v853_v12 = vld [vmem:[%s3205_s3 + $0x90] sm:$0xff] }
 0x24c   : > { %v942_v25 = vpop.permute.xlu1 %941  ;;  %v2239_v18 = vpop.eup %2238  ;;  %2252 = vlog2.f32 %v1156_v1 }
 0x24d   : > { %v995_v56 = vmul.f32 %v942_v25, %v851_v40  ;;  %v2835_v57 = vadd.f32 %v1223_v26, %v1031_v45  ;;  %v1224_v26 = vsub.f32 0.0, %v1182_v52  ;;  %v2241_v28 = vpop.eup %2240  ;;  %v1184_v40 = vmul.f32 0.6931472, %v2235_v61  ;;  %v1009_v52 = vld [vmem:[%s3206_s4 + $0x30] sm:$0xff] }
 0x24e   : > { %v1122_v45 = vmul.f32 0.6931472, %v2237_v16  ;;  %v1144_v51 = vmul.f32 0.6931472, %v2239_v18  ;;  %v1044_v61 = vadd.f32 %v1020_v42, %v996_v33  ;;  %2254 = vlog2.f32 %v1157_v44  ;;  %v842_v44 = vld [vmem:[%s3205_s3 + $0x38] sm:$0xff] }
 0x24f   : > { %v1043_v7 = vadd.f32 %v1019_v50, %v995_v56  ;;  %1299 = vrot.lane.b32.xlu1 %v2835_v57, %s2277_s12  ;;  %1321 = vrot.lane.b32.xlu0 %v2837_v58, %s2277_s12  ;;  %v2243_v50 = vpop.eup %2242  ;;  %v1236_v56 = vsub.f32 0.0, %v1206_v27  ;;  %2256 = vlog2.f32 %v1168_v49 }
 0x250   : > { %v887_v24 = vpop.permute.xlu1 %886  ;;  %v957_v25 = vpop.permute.xlu0 %956  ;;  %v1158_v16 = vsub.f32 1e-10, %v1122_v45  ;;  %v1169_v1 = vsub.f32 1e-10, %v1144_v51  ;;  %v1146_v17 = vmul.f32 0.6931472, %v2243_v50 }
 0x251   : > { %v984_v34 = vmul.f32 %v887_v24, %v840_v14  ;;  %v2852_v37 = vadd.f32 %v1235_v59, %v1043_v7  ;;  %v1208_v59 = vmul.f32 0.6931472, %v2241_v28  ;;  %v1225_v14 = vsub.f32 0.0, %v1184_v40  ;;  %v2245_v60 = vpop.eup %2244  ;;  %v1010_v51 = vld [vmem:[%s3206_s4 + $0x38] sm:$0xff] }
 0x252   : > { %v2247_v18 = vpop.eup %2246  ;;  %v2877_v40 = vadd.f32 %v1236_v56, %v1044_v61  ;;  %v1186_v42 = vmul.f32 0.6931472, %v2245_v60  ;;  %2258 = vlog2.f32 %v1158_v16  ;;  %v1022_v60 = vld [vmem:[%s3206_s4 + $0x98] sm:$0xff] }
 0x253   : > { %v1032_v48 = vadd.f32 %v1008_v21, %v984_v34  ;;  %1323 = vrot.lane.b32.xlu1 %v2852_v37, %s2277_s12  ;;  %v1021_v21 = vld [vmem:[%s3206_s4 + $0x90] sm:$0xff]  ;;  %v1237_v27 = vsub.f32 0.0, %v1208_v59  ;;  %v2249_v28 = vpop.eup %2248  ;;  %2260 = vlog2.f32 %v1169_v1 }
 0x254   : > { %v892_v53 = vpop.permute.xlu1 %891  ;;  %v2251_v49 = vpop.eup %2250 }
 0x255   : > { %v985_v3 = vmul.f32 %v892_v53, %v841_v43  ;;  %v2865_v9 = vadd.f32 %v1224_v26, %v1032_v48  ;;  %v854_v43 = vld [vmem:[%s3205_s3 + $0x98] sm:$0xff]  ;;  %v1170_v48 = vsub.f32 1e-10, %v1146_v17  ;;  %v1210_v53 = vmul.f32 0.6931472, %v2249_v28 }
 0x256   : > { %v2253_v56 = vpop.eup %2252  ;;  %v998_v59 = vmul.f32 %v957_v25, %v854_v43  ;;  %v1011_v25 = vld [vmem:[%s3206_s4 + $0x40] sm:$0xff] }
 0x257   : > { %v1033_v7 = vadd.f32 %v1009_v52, %v985_v3  ;;  %1301 = vrot.lane.b32.xlu0 %v2865_v9, %s2277_s12  ;;  %v1188_v52 = vmul.f32 0.6931472, %v2247_v18  ;;  %2262 = vlog2.f32 %v1170_v48  ;;  %v1190_v28 = vmul.f32 0.6931472, %v2253_v56  ;;  %v1012_v48 = vld [vmem:[%s3206_s4 + $0x48] sm:$0xff] }
 0x258   : > { %v952_v24 = vpop.permute.xlu1 %951  ;;  %v907_v26 = vpop.permute.xlu0 %906 }
 0x259   : > { %v997_v33 = vmul.f32 %v952_v24, %v853_v12  ;;  %v2875_v34 = vadd.f32 %v1225_v14, %v1033_v7  ;;  %v1226_v14 = vsub.f32 0.0, %v1186_v42  ;;  %v844_v12 = vld [vmem:[%s3205_s3 + $0x48] sm:$0xff]  ;;  %v843_v7 = vld [vmem:[%s3205_s3 + $0x40] sm:$0xff]  ;;  %v2255_v17 = vpop.eup %2254  ;;  %v1238_v24 = vsub.f32 0.0, %v1210_v53 }
 0x25a   : > { %v1046_v42 = vadd.f32 %v1022_v60, %v998_v59  ;;  %v988_v43 = vmul.f32 %v907_v26, %v844_v12  ;;  %v1192_v26 = vmul.f32 0.6931472, %v2255_v17  ;;  %v1023_v59 = vld [vmem:[%s3206_s4 + $0xa0] sm:$0xff]  ;;  %v1228_v60 = vsub.f32 0.0, %v1190_v28 }
 0x25b   : > { %v1045_v45 = vadd.f32 %v1021_v21, %v997_v33  ;;  %1303 = vrot.lane.b32.xlu1 %v2875_v34, %s2277_s12  ;;  %1325 = vrot.lane.b32.xlu0 %v2877_v40, %s2277_s12  ;;  %v1227_v21 = vsub.f32 0.0, %v1188_v52  ;;  %v2257_v33 = vpop.eup %2256 }
 0x25c   : > { %v897_v50 = vpop.permute.xlu1 %896  ;;  %v967_v16 = vpop.permute.xlu0 %966  ;;  %v1214_v12 = vmul.f32 0.6931472, %v2257_v33  ;;  %v2929_v17 = vadd.f32 %v1238_v24, %v1046_v42  ;;  %v1229_v33 = vsub.f32 0.0, %v1192_v26  ;;  %v1013_v24 = vld [vmem:[%s3206_s4 + $0x50] sm:$0xff]  ;;  %v1014_v26 = vld [vmem:[%s3206_s4 + $0x58] sm:$0xff] }
 0x25d   : > { %v986_v61 = vmul.f32 %v897_v50, %v842_v44  ;;  %v2892_v3 = vadd.f32 %v1237_v27, %v1045_v45  ;;  %v1212_v27 = vmul.f32 0.6931472, %v2251_v49  ;;  %v856_v44 = vld [vmem:[%s3205_s3 + $0xa8] sm:$0xff]  ;;  %v855_v50 = vld [vmem:[%s3205_s3 + $0xa0] sm:$0xff]  ;;  %v2259_v52 = vpop.eup %2258 }
 0x25e   : > { %v1000_v53 = vmul.f32 %v967_v16, %v856_v44  ;;  %v846_v16 = vld [vmem:[%s3205_s3 + $0x58] sm:$0xff] }
 0x25f   : > { %v1034_v1 = vadd.f32 %v1010_v51, %v986_v61  ;;  %1327 = vrot.lane.b32.xlu1 %v2892_v3, %s2277_s12 }
 0x260   : > { %v902_v18 = vpop.permute.xlu1 %901  ;;  %v917_v56 = vpop.permute.xlu0 %916 }
 0x261   : > { %v987_v45 = vmul.f32 %v902_v18, %v843_v7  ;;  %v2911_v51 = vadd.f32 %v1226_v14, %v1034_v1  ;;  %v1239_v14 = vsub.f32 0.0, %v1212_v27  ;;  %v2261_v7 = vpop.eup %2260  ;;  %v1036_v1 = vadd.f32 %v1012_v48, %v988_v43  ;;  %v845_v27 = vld [vmem:[%s3205_s3 + $0x50] sm:$0xff] }
 0x262   : > { %v1240_v43 = vsub.f32 0.0, %v1214_v12  ;;  %v1216_v44 = vmul.f32 0.6931472, %v2261_v7  ;;  %v1194_v48 = vmul.f32 0.6931472, %v2259_v52  ;;  %v857_v52 = vld [vmem:[%s3205_s3 + $0xb0] sm:$0xff] }
 0x263   : > { %v1035_v49 = vadd.f32 %v1011_v25, %v987_v45  ;;  %1305 = vrot.lane.b32.xlu0 %v2911_v51, %s2277_s12  ;;  %v1024_v25 = vld [vmem:[%s3206_s4 + $0xa8] sm:$0xff] }
 0x264   : > { %v962_v61 = vpop.permute.xlu1 %961  ;;  %v1241_v7 = vsub.f32 0.0, %v1216_v44 }
 0x265   : > { %v999_v18 = vmul.f32 %v962_v61, %v855_v50  ;;  %v2927_v45 = vadd.f32 %v1227_v21, %v1035_v49  ;;  %v1048_v21 = vadd.f32 %v1024_v25, %v1000_v53  ;;  %v2263_v50 = vpop.eup %2262  ;;  %v990_v49 = vmul.f32 %v917_v56, %v846_v16  ;;  %v858_v53 = vld [vmem:[%s3205_s3 + $0xb8] sm:$0xff]  ;;  %v977_v25 = vpop.permute.xlu0 %976  ;;  %v1025_v56 = vld [vmem:[%s3206_s4 + $0xb0] sm:$0xff] }
 0x266   : > { %v1218_v16 = vmul.f32 0.6931472, %v2263_v50 }
 0x267   : > { %v1047_v28 = vadd.f32 %v1023_v59, %v999_v18  ;;  %1307 = vrot.lane.b32.xlu1 %v2927_v45, %s2277_s12  ;;  %1329 = vrot.lane.b32.xlu0 %v2929_v17, %s2277_s12  ;;  %v2946_v18 = vadd.f32 %v1228_v60, %v1036_v1  ;;  %v2964_v60 = vadd.f32 %v1240_v43, %v1048_v21  ;;  %v1230_v1 = vsub.f32 0.0, %v1194_v48 }
 0x268   : > { %v912_v42 = vpop.permute.xlu1 %911  ;;  %v1242_v48 = vsub.f32 0.0, %v1218_v16 }
 0x269   : > { %v989_v61 = vmul.f32 %v912_v42, %v845_v27  ;;  %v2944_v59 = vadd.f32 %v1239_v14, %v1047_v28  ;;  %v1038_v27 = vadd.f32 %v1014_v26, %v990_v49  ;;  %v1002_v28 = vmul.f32 %v977_v25, %v858_v53 }
 0x26a   : > { %v2278_v26 = vmov 0.0  }
 0x26b   : > { %v1037_v12 = vadd.f32 %v1013_v24, %v989_v61  ;;  %1331 = vrot.lane.b32.xlu1 %v2944_v59, %s2277_s12  ;;  %1309 = vrot.lane.b32.xlu0 %v2946_v18, %s2277_s12  ;;  %v1026_v61 = vld [vmem:[%s3206_s4 + $0xb8] sm:$0xff]  ;;  %v2977_v44 = vadd.f32 %v1230_v1, %v1038_v27 }
 0x26c   : > { %v972_v14 = vpop.permute.xlu1 %971  ;;  %v1050_v21 = vadd.f32 %v1026_v61, %v1002_v28 }
 0x26d   : > { %v1001_v42 = vmul.f32 %v972_v14, %v857_v52  ;;  %v2966_v24 = vadd.f32 %v1229_v33, %v1037_v12 }
 0x26e   : > { %v2983_v33 = vadd.f32 %v1242_v48, %v1050_v21 }
 0x26f   : > { %v1049_v29 = vadd.f32 %v1025_v56, %v1001_v42  ;;  %1311 = vrot.lane.b32.xlu1 %v2966_v24, %s2277_s12  ;;  %1333 = vrot.lane.b32.xlu0 %v2964_v60, %s2277_s12 }
 0x271   : > { %v2975_v43 = vadd.f32 %v1241_v7, %v1049_v29 }
 0x273   : > { %1335 = vrot.lane.b32.xlu1 %v2975_v43, %s2277_s12  ;;  %1313 = vrot.lane.b32.xlu0 %v2977_v44, %s2277_s12 }
 0x277   : > { %1337 = vrot.lane.b32.xlu0 %v2983_v33, %s2277_s12  ;;  %s2279_s12 = smov 127  }
 0x2ad   : > { %v1292_v50 = vpop.permute.xlu1 %1291 }
 0x2ae   : > { %vm1363_vm1 = vcmp.gt.f32.partialorder %v2766_v41, %v1292_v50 }
 0x2af   : > { %v2001_v53 = vsel %vm1363_vm1, 1.0, %v2278_v26 }
 0x2b1   : > { %v1316_v49 = vpop.permute.xlu1 %1315  ;;  %v1294_v29 = vpop.permute.xlu0 %1293 }
 0x2b2   : > { %vm1364_vm2 = vcmp.gt.f32.partialorder %v2778_v4, %v1294_v29  ;;  %vm1375_vm3 = vcmp.gt.f32.partialorder %v2780_v5, %v1316_v49 }
 0x2b3   : > { %v2002_v25 = vsel %vm1364_vm2, 1.0, %v2278_v26  ;;  %v2013_v41 = vsel %vm1375_vm3, 1.0, %v2278_v26 }
 0x2b4   : > { %v2106_v52 = vpack.i.bf16 %v2002_v25, %v2001_v53  ;;  %v1556_v12 = vpack.c.bf16 %v2002_v25, %v2001_v53 }
 0x2b5   : > { %v1318_v56 = vpop.permute.xlu0 %1317  ;;  %v1296_v14 = vpop.permute.xlu1 %1295 }
 0x2b6   : > { %vm1376_vm4 = vcmp.gt.f32.partialorder %v2790_v15, %v1318_v56  ;;  %2107 = vrot.lane.b32.xlu1 %v2106_v52, %s2279_s12  ;;  %1570 = vperm.xlu0 %2116, %v1556_v12   ;;  %vm1365_vm5 = vcmp.gt.f32.partialorder %v2796_v36, %v1296_v14 }
 0x2b7   : > { %v2014_v4 = vsel %vm1376_vm4, 1.0, %v2278_v26  ;;  %v2003_v15 = vsel %vm1365_vm5, 1.0, %v2278_v26 }
 0x2b8   : > { %v2111_v7 = vpack.i.bf16 %v2014_v4, %v2013_v41  ;;  %v1562_v5 = vpack.c.bf16 %v2014_v4, %v2013_v41 }
 0x2b9   : > { %v1320_v1 = vpop.permute.xlu1 %1319 }
 0x2ba   : > { %2112 = vrot.lane.b32.xlu1 %v2111_v7, %s2279_s12  ;;  %vm1377_vm7 = vcmp.gt.f32.partialorder %v2812_v6, %v1320_v1 }
 0x2bb   : > { %v3005_v36 = vsel %vm1377_vm7, 1.0, %v2278_v26 }
 0x2bd   : > { %v1298_v16 = vpop.permute.xlu0 %1297 }
 0x2be   : > { %vm1366_vm6 = vcmp.gt.f32.partialorder %v2825_v35, %v1298_v16  ;;  %1594 = vperm.xlu1 %2117, %v1562_v5  }
 0x2bf   : > { %v2004_v27 = vsel %vm1366_vm6, 1.0, %v2278_v26 }
 0x2c0   : > { %v2118_v28 = vpack.i.bf16 %v2004_v27, %v2003_v15  ;;  %v1557_v42 = vpack.c.bf16 %v2004_v27, %v2003_v15 }
 0x2c1   : > { %v1322_v61 = vpop.permute.xlu0 %1321  ;;  %v1300_v48 = vpop.permute.xlu1 %1299 }
 0x2c2   : > { %vm1378_vm8 = vcmp.gt.f32.partialorder %v2837_v58, %v1322_v61  ;;  %2119 = vrot.lane.b32.xlu0 %v2118_v28, %s2279_s12  ;;  %1574 = vperm.xlu1 %2117, %v1557_v42   ;;  %vm1367_vm9 = vcmp.gt.f32.partialorder %v2835_v57, %v1300_v48 }
 0x2c3   : > { %v3008_v35 = vsel %vm1378_vm8, 1.0, %v2278_v26  ;;  %v2005_v58 = vsel %vm1367_vm9, 1.0, %v2278_v26  ;;  %vm1531_vm9 = vcmask 7168  }
 0x2c4   : > { %v1563_v21 = vpack.c.bf16 %v3008_v35, %v3005_v36 }
 0x2c5   : > { %v1324_v50 = vpop.permute.xlu1 %1323 }
 0x2c6   : > { %1598 = vperm.xlu0 %2116, %v1563_v21   ;;  %vm1379_vm12 = vcmp.gt.f32.partialorder %v2852_v37, %v1324_v50 }
 0x2c9   : > { %v1302_v6 = vpop.permute.xlu0 %1301 }
 0x2ca   : > { %vm1368_vm10 = vcmp.gt.f32.partialorder %v2865_v9, %v1302_v6  ;;  %v3023_v9 = vsel %vm1379_vm12, 1.0, %v2278_v26 }
 0x2cb   : > { %v2006_v49 = vsel %vm1368_vm10, 1.0, %v2278_v26 }
 0x2cc   : > { %v2123_v29 = vpack.i.bf16 %v2006_v49, %v2005_v58  ;;  %v1558_v52 = vpack.c.bf16 %v2006_v49, %v2005_v58 }
 0x2cd   : > { %v1326_v53 = vpop.permute.xlu0 %1325  ;;  %v1304_v25 = vpop.permute.xlu1 %1303 }
 0x2ce   : > { %vm1380_vm11 = vcmp.gt.f32.partialorder %v2877_v40, %v1326_v53  ;;  %2124 = vrot.lane.b32.xlu1 %v2123_v29, %s2279_s12  ;;  %vm1369_vm13 = vcmp.gt.f32.partialorder %v2875_v34, %v1304_v25 }
 0x2cf   : > { %v3020_v57 = vsel %vm1380_vm11, 1.0, %v2278_v26  ;;  %v2007_v37 = vsel %vm1369_vm13, 1.0, %v2278_v26 }
 0x2d0   : > { %v1564_v12 = vpack.c.bf16 %v3020_v57, %v3023_v9 }
 0x2d1   : > { %v1328_v56 = vpop.permute.xlu1 %1327 }
 0x2d2   : > { %1578 = vperm.xlu1 %2117, %v1558_v52   ;;  %vm1381_vm0 = vcmp.gt.f32.partialorder %v2892_v3, %v1328_v56  ;;  %v2281_v56 = vmov 1985246804  }
 0x2d3   : > { %v2019_v16 = vsel %vm1381_vm0, 1.0, %v2278_v26 }
 0x2d5   : > { %v1306_v40 = vpop.permute.xlu0 %1305 }
 0x2d6   : > { %vm1370_vm14 = vcmp.gt.f32.partialorder %v2911_v51, %v1306_v40  ;;  %1602 = vperm.xlu1 %2117, %v1564_v12   ;;  %v1631_v12 = vlaneseq  ;;  %v1636_v40 = vunpack.c.l.s4 %v2281_v56 }
 0x2d7   : > { %v2008_v41 = vsel %vm1370_vm14, 1.0, %v2278_v26 }
 0x2d8   : > { %v2128_v14 = vpack.i.bf16 %v2008_v41, %v2007_v37  ;;  %v1559_v34 = vpack.c.bf16 %v2008_v41, %v2007_v37 }
 0x2d9   : > { %v1308_v4 = vpop.permute.xlu1 %1307  ;;  %v1330_v7 = vpop.permute.xlu0 %1329 }
 0x2da   : > { %vm1382_vm15 = vcmp.gt.f32.partialorder %v2929_v17, %v1330_v7  ;;  %2129 = vrot.lane.b32.xlu0 %v2128_v14, %s2279_s12  ;;  %vm1371_vm1 = vcmp.gt.f32.partialorder %v2927_v45, %v1308_v4  ;;  %v1632_v7 = vshrl.u32 %v1631_v12, 7 }
 0x2db   : > { %v2020_v5 = vsel %vm1382_vm15, 1.0, %v2278_v26  ;;  %v2009_v15 = vsel %vm1371_vm1, 1.0, %v2278_v26 }
 0x2dc   : > { %v1565_v27 = vpack.c.bf16 %v2020_v5, %v2019_v16  ;;  %v2153_v53 = vpack.i.bf16 %v2020_v5, %v2019_v16 }
 0x2dd   : > { %v1332_v51 = vpop.permute.xlu1 %1331  ;;  %v1310_v1 = vpop.permute.xlu0 %1309 }
 0x2de   : > { %vm1372_vm2 = vcmp.gt.f32.partialorder %v2946_v18, %v1310_v1  ;;  %1582 = vperm.xlu0 %2116, %v1559_v34   ;;  %vm1383_vm4 = vcmp.gt.f32.partialorder %v2944_v59, %v1332_v51  ;;  %v2138_v59 = vpack.i.bf16 %v3008_v35, %v3005_v36  ;;  %v1637_v34 = vunpack.c.0.s8 %v1636_v40 }
 0x2df   : > { %v2010_v17 = vsel %vm1372_vm2, 1.0, %v2278_v26  ;;  %v2021_v21 = vsel %vm1383_vm4, 1.0, %v2278_v26 }
 0x2e0   : > { %v2133_v28 = vpack.i.bf16 %v2010_v17, %v2009_v15  ;;  %v1560_v45 = vpack.c.bf16 %v2010_v17, %v2009_v15  ;;  %v3079_v51 = vsub.s32 %v1637_v34, %v1632_v7  ;;  %v2264_v17 = vld [vmem:[%s2336_s29] sm:$0xff] }
 0x2e1   : > { %v1312_v42 = vpop.permute.xlu1 %1311  ;;  %v1334_v3 = vpop.permute.xlu0 %1333 }
 0x2e2   : > { %vm1384_vm3 = vcmp.gt.f32.partialorder %v2964_v60, %v1334_v3  ;;  %1606 = vperm.xlu0 %2116, %v1565_v27   ;;  %2134 = vrot.lane.b32.xlu1 %v2133_v28, %s2279_s12  ;;  %vm1373_vm5 = vcmp.gt.f32.partialorder %v2966_v24, %v1312_v42  ;;  %v2265_v28 = vld [vmem:[%s2336_s29 + $0x8] sm:$0xff] }
 0x2e3   : > { %v2022_v18 = vsel %vm1384_vm3, 1.0, %v2278_v26  ;;  %v2011_v48 = vsel %vm1373_vm5, 1.0, %v2278_v26 }
 0x2e4   : > { %v1566_v6 = vpack.c.bf16 %v2022_v18, %v2021_v21 }
 0x2e5   : > { %v1314_v61 = vpop.permute.xlu0 %1313  ;;  %v1336_v50 = vpop.permute.xlu1 %1335 }
 0x2e6   : > { %vm1374_vm6 = vcmp.gt.f32.partialorder %v2977_v44, %v1314_v61  ;;  %1586 = vperm.xlu1 %2117, %v1560_v45   ;;  %vm1385_vm8 = vcmp.gt.f32.partialorder %v2975_v43, %v1336_v50  ;;  %v2158_v43 = vpack.i.bf16 %v2022_v18, %v2021_v21 }
 0x2e7   : > { %v2012_v60 = vsel %vm1374_vm6, 1.0, %v2278_v26  ;;  %v2023_v29 = vsel %vm1385_vm8, 1.0, %v2278_v26 }
 0x2e8   : > { %v2143_v58 = vpack.i.bf16 %v2012_v60, %v2011_v48  ;;  %v1561_v24 = vpack.c.bf16 %v2012_v60, %v2011_v48 }
 0x2e9   : > { %v1338_v49 = vpop.permute.xlu0 %1337 }
 0x2ea   : > { %vm1386_vm7 = vcmp.gt.f32.partialorder %v2983_v33, %v1338_v49  ;;  %1610 = vperm.xlu1 %2117, %v1566_v6   ;;  %2144 = vrot.lane.b32.xlu0 %v2143_v58, %s2279_s12  ;;  %v2148_v33 = vpack.i.bf16 %v3020_v57, %v3023_v9  ;;  %v2280_v57 = vmov 839922192  }
 0x2eb   : > { %v2024_v44 = vsel %vm1386_vm7, 1.0, %v2278_v26  ;;  %v1629_v9 = vunpack.c.l.s4 %v2280_v57 }
 0x2ec   : > { %v1567_v25 = vpack.c.bf16 %v2024_v44, %v2023_v29  ;;  %v2163_v36 = vpack.i.bf16 %v2024_v44, %v2023_v29 }
 0x2ed   : > { %v1630_v4 = vunpack.c.0.s8 %v1629_v9 }
 0x2ee   : > { %2139 = vrot.lane.b32.xlu1 %v2138_v59, %s2279_s12  ;;  %1590 = vperm.xlu0 %2116, %v1561_v24  }
 0x2ef   : > { %v3077_v5 = vsub.s32 %v1630_v4, %v1632_v7 }
 0x2f2   : > { %2154 = vrot.lane.b32.xlu1 %v2153_v53, %s2279_s12  ;;  %1614 = vperm.xlu0 %2116, %v1567_v25  }
 0x2f6   : > { %2164 = vrot.lane.b32.xlu1 %v2163_v36, %s2279_s12  ;;  %2149 = vrot.lane.b32.xlu0 %v2148_v33, %s2279_s12 }
 0x2fa   : > { %2159 = vrot.lane.b32.xlu0 %v2158_v43, %s2279_s12 }
 0x328   : > { %v2108_v26 = vpop.permute.xlu1 %2107 }
 0x329   : > { %v2110_v35 = vunpack.i.h.bf16 %v2108_v26  ;;  %v2109_v52 = vunpack.i.l.bf16 %v2108_v26 }
 0x32b   : > { %1533 = vst.msk [vmem:[%s3067_s18 + $0x8] sm:$0xff] %vm1531_vm9, %v2110_v35  ;;  %1532 = vst.msk [vmem:[%s3067_s18] sm:$0xff] %vm1531_vm9, %v2109_v52 }
 0x32c   : > { %v2113_v37 = vpop.permute.xlu1 %2112 }
 0x32d   : > { %v2115_v41 = vunpack.i.h.bf16 %v2113_v37  ;;  %v2114_v14 = vunpack.i.l.bf16 %v2113_v37 }
 0x32f   : > { %1545 = vst.msk [vmem:[%s3067_s18 + $0x68] sm:$0xff] %vm1531_vm9, %v2115_v41  ;;  %1544 = vst.msk [vmem:[%s3067_s18 + $0x60] sm:$0xff] %vm1531_vm9, %v2114_v14 }
 0x335   : > { %v1571_v1 = vpop.permute.xlu0 %1570 }
 0x336   : > { %v1634_v16 = vrot.slane %v1571_v1, %v3077_v5  ;;  %v1641_v15 = vrot.slane %v1571_v1, %v3079_v51 }
 0x338   : > { %v1820_v27 = vmul.bf16 %v2264_v17, %v1634_v16  ;;  %v1821_v42 = vmul.bf16 %v2265_v28, %v1641_v15 }
 0x339   : > { %v2120_v3 = vpop.permute.xlu0 %2119 }
 0x33a   : > { %1844 = vst [vmem:[%s3087_s21] sm:$0xff] %v1820_v27  ;;  %1845 = vst [vmem:[%s3087_s21 + $0x8] sm:$0xff] %v1821_v42  ;;  %v2122_v45 = vunpack.i.h.bf16 %v2120_v3  ;;  %v2121_v18 = vunpack.i.l.bf16 %v2120_v3 }
 0x33c   : > { %1535 = vst.msk [vmem:[%s3067_s18 + $0x18] sm:$0xff] %vm1531_vm9, %v2122_v45  ;;  %1534 = vst.msk [vmem:[%s3067_s18 + $0x10] sm:$0xff] %vm1531_vm9, %v2121_v18 }
 0x33d   : > { %v1595_v61 = vpop.permute.xlu1 %1594 }
 0x33e   : > { %v1718_v21 = vrot.slane %v1595_v61, %v3077_v5  ;;  %v1725_v48 = vrot.slane %v1595_v61, %v3079_v51 }
 0x340   : > { %v1832_v60 = vmul.bf16 %v1718_v21, %v2394_v47  ;;  %v1833_v6 = vmul.bf16 %v1725_v48, %v2391_v46 }
 0x341   : > { %v1575_v58 = vpop.permute.xlu1 %1574 }
 0x342   : > { %1856 = vst [vmem:[%s3087_s21 + $0x60] sm:$0xff] %v1832_v60  ;;  %1857 = vst [vmem:[%s3087_s21 + $0x68] sm:$0xff] %v1833_v6  ;;  %v1648_v50 = vrot.slane %v1575_v58, %v3077_v5  ;;  %v1655_v49 = vrot.slane %v1575_v58, %v3079_v51 }
 0x344   : > { %v1822_v59 = vmul.bf16 %v1648_v50, %v2339_v0  ;;  %v1823_v24 = vmul.bf16 %v1655_v49, %v2343_v2 }
 0x345   : > { %v2125_v44 = vpop.permute.xlu1 %2124  ;;  %v1599_v29 = vpop.permute.xlu0 %1598 }
 0x346   : > { %1846 = vst [vmem:[%s3087_s21 + $0x10] sm:$0xff] %v1822_v59  ;;  %1847 = vst [vmem:[%s3087_s21 + $0x18] sm:$0xff] %v1823_v24  ;;  %v2127_v46 = vunpack.i.h.bf16 %v2125_v44  ;;  %v2126_v47 = vunpack.i.l.bf16 %v2125_v44  ;;  %v1732_v53 = vrot.slane %v1599_v29, %v3077_v5  ;;  %v1739_v25 = vrot.slane %v1599_v29, %v3079_v51 }
 0x348   : > { %1537 = vst.msk [vmem:[%s3067_s18 + $0x28] sm:$0xff] %vm1531_vm9, %v2127_v46  ;;  %1536 = vst.msk [vmem:[%s3067_s18 + $0x20] sm:$0xff] %vm1531_vm9, %v2126_v47  ;;  %v1834_v0 = vmul.bf16 %v1732_v53, %v2404_v55  ;;  %v1835_v2 = vmul.bf16 %v1739_v25, %v2401_v54 }
 0x34a   : > { %1858 = vst [vmem:[%s3087_s21 + $0x70] sm:$0xff] %v1834_v0  ;;  %1859 = vst [vmem:[%s3087_s21 + $0x78] sm:$0xff] %v1835_v2 }
 0x34c   : > { %v2130_v33 = vpop.permute.xlu0 %2129 }
 0x34d   : > { %v2132_v36 = vunpack.i.h.bf16 %v2130_v33  ;;  %v2131_v43 = vunpack.i.l.bf16 %v2130_v33 }
 0x34f   : > { %1539 = vst.msk [vmem:[%s3067_s18 + $0x38] sm:$0xff] %vm1531_vm9, %v2132_v36  ;;  %1538 = vst.msk [vmem:[%s3067_s18 + $0x30] sm:$0xff] %vm1531_vm9, %v2131_v43 }
 0x351   : > { %v1579_v26 = vpop.permute.xlu1 %1578 }
 0x352   : > { %v1662_v35 = vrot.slane %v1579_v26, %v3077_v5  ;;  %v1669_v55 = vrot.slane %v1579_v26, %v3079_v51 }
 0x354   : > { %v1824_v54 = vmul.bf16 %v1662_v35, %v2354_v13  ;;  %v1825_v52 = vmul.bf16 %v1669_v55, %v2349_v8 }
 0x355   : > { %v1603_v57 = vpop.permute.xlu1 %1602 }
 0x356   : > { %1848 = vst [vmem:[%s3087_s21 + $0x20] sm:$0xff] %v1824_v54  ;;  %1849 = vst [vmem:[%s3087_s21 + $0x28] sm:$0xff] %v1825_v52  ;;  %v1746_v9 = vrot.slane %v1603_v57, %v3077_v5  ;;  %v1753_v12 = vrot.slane %v1603_v57, %v3079_v51 }
 0x358   : > { %v1836_v56 = vmul.bf16 %v1746_v9, %v2414_v63  ;;  %v1837_v40 = vmul.bf16 %v1753_v12, %v2411_v62 }
 0x359   : > { %v2135_v37 = vpop.permute.xlu1 %2134 }
 0x35a   : > { %1860 = vst [vmem:[%s3087_s21 + $0x80] sm:$0xff] %v1836_v56  ;;  %1861 = vst [vmem:[%s3087_s21 + $0x88] sm:$0xff] %v1837_v40  ;;  %v2137_v41 = vunpack.i.h.bf16 %v2135_v37  ;;  %v2136_v13 = vunpack.i.l.bf16 %v2135_v37 }
 0x35c   : > { %1541 = vst.msk [vmem:[%s3067_s18 + $0x48] sm:$0xff] %vm1531_vm9, %v2137_v41  ;;  %1540 = vst.msk [vmem:[%s3067_s18 + $0x40] sm:$0xff] %vm1531_vm9, %v2136_v13 }
 0x35d   : > { %v1583_v8 = vpop.permute.xlu0 %1582 }
 0x35e   : > { %v1676_v14 = vrot.slane %v1583_v8, %v3077_v5  ;;  %v1683_v4 = vrot.slane %v1583_v8, %v3079_v51 }
 0x360   : > { %v1826_v63 = vmul.bf16 %v1676_v14, %v2364_v23  ;;  %v1827_v62 = vmul.bf16 %v1683_v4, %v2361_v22 }
 0x361   : > { %v1607_v7 = vpop.permute.xlu0 %1606 }
 0x362   : > { %1850 = vst [vmem:[%s3087_s21 + $0x30] sm:$0xff] %v1826_v63  ;;  %1851 = vst [vmem:[%s3087_s21 + $0x38] sm:$0xff] %v1827_v62  ;;  %v1760_v34 = vrot.slane %v1607_v7, %v3077_v5  ;;  %v1767_v1 = vrot.slane %v1607_v7, %v3079_v51 }
 0x364   : > { %v1838_v16 = vmul.bf16 %v1760_v34, %v2426_v11  ;;  %v1839_v15 = vmul.bf16 %v1767_v1, %v2423_v10 }
 0x365   : > { %v1587_v17 = vpop.permute.xlu1 %1586  ;;  %v2145_v27 = vpop.permute.xlu0 %2144 }
 0x366   : > { %1862 = vst [vmem:[%s3087_s21 + $0x90] sm:$0xff] %v1838_v16  ;;  %1863 = vst [vmem:[%s3087_s21 + $0x98] sm:$0xff] %v1839_v15  ;;  %v1690_v22 = vrot.slane %v1587_v17, %v3077_v5  ;;  %v1697_v23 = vrot.slane %v1587_v17, %v3079_v51  ;;  %v2147_v28 = vunpack.i.h.bf16 %v2145_v27  ;;  %v2146_v42 = vunpack.i.l.bf16 %v2145_v27 }
 0x368   : > { %v1828_v3 = vmul.bf16 %v1690_v22, %v2374_v31  ;;  %v1829_v45 = vmul.bf16 %v1697_v23, %v2371_v30  ;;  %1543 = vst.msk [vmem:[%s3067_s18 + $0x58] sm:$0xff] %vm1531_vm9, %v2147_v28  ;;  %1542 = vst.msk [vmem:[%s3067_s18 + $0x50] sm:$0xff] %vm1531_vm9, %v2146_v42 }
 0x369   : > { %v1611_v10 = vpop.permute.xlu1 %1610 }
 0x36a   : > { %1852 = vst [vmem:[%s3087_s21 + $0x40] sm:$0xff] %v1828_v3  ;;  %1853 = vst [vmem:[%s3087_s21 + $0x48] sm:$0xff] %v1829_v45  ;;  %v1774_v11 = vrot.slane %v1611_v10, %v3077_v5  ;;  %v1781_v18 = vrot.slane %v1611_v10, %v3079_v51 }
 0x36c   : > { %v1840_v61 = vmul.bf16 %v1774_v11, %v2436_v20  ;;  %v1841_v31 = vmul.bf16 %v1781_v18, %v2433_v19 }
 0x36d   : > { %v2140_v30 = vpop.permute.xlu1 %2139  ;;  %v1591_v21 = vpop.permute.xlu0 %1590 }
 0x36e   : > { %1864 = vst [vmem:[%s3087_s21 + $0xa0] sm:$0xff] %v1840_v61  ;;  %1865 = vst [vmem:[%s3087_s21 + $0xa8] sm:$0xff] %v1841_v31  ;;  %v2142_v48 = vunpack.i.h.bf16 %v2140_v30  ;;  %v2141_v60 = vunpack.i.l.bf16 %v2140_v30  ;;  %v1704_v6 = vrot.slane %v1591_v21, %v3077_v5  ;;  %v1711_v58 = vrot.slane %v1591_v21, %v3079_v51 }
 0x370   : > { %1547 = vst.msk [vmem:[%s3067_s18 + $0x78] sm:$0xff] %vm1531_vm9, %v2142_v48  ;;  %1546 = vst.msk [vmem:[%s3067_s18 + $0x70] sm:$0xff] %vm1531_vm9, %v2141_v60  ;;  %v1830_v20 = vmul.bf16 %v1704_v6, %v2384_v39  ;;  %v1831_v19 = vmul.bf16 %v1711_v58, %v2381_v38  ;;  %v3212_v39 = vld [vmem:[#allocation2_spill] sm:$0xff] }
 0x371   : > { %v2155_v50 = vpop.permute.xlu1 %2154  ;;  %v1615_v49 = vpop.permute.xlu0 %1614 }
 0x372   : > { %1854 = vst [vmem:[%s3087_s21 + $0x50] sm:$0xff] %v1830_v20  ;;  %1855 = vst [vmem:[%s3087_s21 + $0x58] sm:$0xff] %v1831_v19  ;;  %v2157_v59 = vunpack.i.h.bf16 %v2155_v50  ;;  %v2156_v24 = vunpack.i.l.bf16 %v2155_v50  ;;  %v1788_v44 = vrot.slane %v1615_v49, %v3077_v5  ;;  %v1795_v29 = vrot.slane %v1615_v49, %v3079_v51 }
 0x374   : > { %1551 = vst.msk [vmem:[%s3067_s18 + $0x98] sm:$0xff] %vm1531_vm9, %v2157_v59  ;;  %1550 = vst.msk [vmem:[%s3067_s18 + $0x90] sm:$0xff] %vm1531_vm9, %v2156_v24  ;;  %v1842_v38 = vmul.bf16 %v1788_v44, %v2446_v32  ;;  %v1843_v46 = vmul.bf16 %v1795_v29, %v3212_v39 }
 0x375   : > { %v2165_v47 = vpop.permute.xlu1 %2164  ;;  %v2150_v53 = vpop.permute.xlu0 %2149 }
 0x376   : > { %1866 = vst [vmem:[%s3087_s21 + $0xb0] sm:$0xff] %v1842_v38  ;;  %1867 = vst [vmem:[%s3087_s21 + $0xb8] sm:$0xff] %v1843_v46  ;;  %v2167_v25 = vunpack.i.h.bf16 %v2165_v47  ;;  %v2166_v5 = vunpack.i.l.bf16 %v2165_v47  ;;  %v2152_v0 = vunpack.i.h.bf16 %v2150_v53  ;;  %v2151_v2 = vunpack.i.l.bf16 %v2150_v53 }
 0x378   : > { %1555 = vst.msk [vmem:[%s3067_s18 + $0xb8] sm:$0xff] %vm1531_vm9, %v2167_v25  ;;  %1554 = vst.msk [vmem:[%s3067_s18 + $0xb0] sm:$0xff] %vm1531_vm9, %v2166_v5 }
 0x379   : > { %1549 = vst.msk [vmem:[%s3067_s18 + $0x88] sm:$0xff] %vm1531_vm9, %v2152_v0  ;;  %1548 = vst.msk [vmem:[%s3067_s18 + $0x80] sm:$0xff] %vm1531_vm9, %v2151_v2  ;;  %v2160_v32 = vpop.permute.xlu0 %2159 }
 0x37a   : > { %v2162_v51 = vunpack.i.h.bf16 %v2160_v32  ;;  %v2161_v33 = vunpack.i.l.bf16 %v2160_v32 }
 0x37c   : > { %1553 = vst.msk [vmem:[%s3067_s18 + $0xa8] sm:$0xff] %vm1531_vm9, %v2162_v51  ;;  %1552 = vst.msk [vmem:[%s3067_s18 + $0xa0] sm:$0xff] %vm1531_vm9, %v2161_v33 }
 0x37d PF: > { %s18_s24 = sadd.s32 1, %s2272_s24  }
 0x37e   : > { %p15_p4 = scmp.ge.s32.totalorder %s18_s24, 4  }
 0x380   :  { %17 = sbr.rel (!%p15_p4) target bundleno = 1 (0x1), region = 89 }

</bundles_post_ra>
